<compile_context>
chip_gen: v6e
topology: v6e:2x2x1
jax: 0.10.0
libtpu: 0.0.40
codegen_flags: <defaults>
</compile_context>

<pallas_src>
import functools

import jax
import jax.numpy as jnp
from jax.experimental import pallas as pl
from jax.experimental.pallas import tpu as pltpu

NEG_SLOPE = 0.1


# ---------------------------------------------------------------------------
# Tile-size helpers (v7x-safe VMEM budgets, larger tiles picked automatically
# when the problem allows it -- v5e/v6e simply end up with bigger tiles).
# ---------------------------------------------------------------------------
def _pick_lane_tile(M, K, Cout, vmem_budget_bytes=4 << 20):
    """Largest multiple-of-128 divisor of M whose double-buffered block set
    ((K + Cout) * TM f32 elements, x2 buffers) stays under the budget."""
    if M % 128 != 0:
        return M
    cap = (vmem_budget_bytes // (8 * (K + Cout))) // 128 * 128
    cap = max(128, min(cap, 4096, M))
    best = 128
    t = 128
    while t <= cap:
        if M % t == 0:
            best = t
        t += 128
    return best


def _pick_batch_tile(B, per_item_elems, vmem_budget_bytes=4 << 20, cap=512):
    """Largest divisor of B whose double-buffered block stays under the budget."""
    max_tb = max(1, vmem_budget_bytes // (8 * per_item_elems))
    max_tb = min(max_tb, cap, B)
    for tb in range(max_tb, 0, -1):
        if B % tb == 0:
            return tb
    return 1


# ---------------------------------------------------------------------------
# Pallas kernels
# ---------------------------------------------------------------------------
def _mm_act_kernel(w_ref, x_ref, o_ref, *, slope):
    # o = act(w @ x) ; w:(Cout,K) resident, x:(K,TM) streamed, o:(Cout,TM) lane-dense
    acc = jnp.dot(w_ref[...], x_ref[...], preferred_element_type=jnp.float32)
    if slope is not None:
        acc = jnp.where(acc >= 0, acc, acc * slope)
    o_ref[...] = acc


def matmul_act_lane(w, x, slope=None):
    """out = act(w @ x); w:(Cout,K), x:(K,M), M lane-dense and tiled/pipelined."""
    Cout, K = w.shape
    K2, M = x.shape
    assert K == K2
    TM = _pick_lane_tile(M, K, Cout)
    return pl.pallas_call(
        functools.partial(_mm_act_kernel, slope=slope),
        grid=(M // TM,),
        in_specs=[
            pl.BlockSpec((Cout, K), lambda i: (0, 0)),   # weights resident
            pl.BlockSpec((K, TM), lambda i: (0, i)),     # stream M tiles
        ],
        out_specs=pl.BlockSpec((Cout, TM), lambda i: (0, i)),
        out_shape=jax.ShapeDtypeStruct((Cout, M), jnp.float32),
        compiler_params=pltpu.CompilerParams(dimension_semantics=("parallel",)),
    )(w, x)


def _euclid_kernel(x_ref, y_ref, o_ref):
    # x:(TB,P,C) queries, y:(TB,Q,C) all candidates; o:(TB,P,Q) squared distances
    x = x_ref[...]
    y = y_ref[...]
    d = -2.0 * jax.lax.dot_general(
        x, y, (((2,), (2,)), ((0,), (0,))),
        preferred_element_type=jnp.float32)                  # (TB,P,Q)
    d = d + jnp.sum(x * x, axis=-1, keepdims=True)           # query norm: once per tile
    d = d + jnp.sum(y * y, axis=-1)[:, None, :]
    o_ref[...] = d


def euclidean_distance(x, y):
    """x:(B,P,C), y:(B,Q,C) -> (B,P,Q); expanded form -2xy + |x|^2 + |y|^2."""
    B, P, C = x.shape
    _, Q, _ = y.shape
    TB = _pick_batch_tile(B, P * C + Q * C + P * Q)
    return pl.pallas_call(
        _euclid_kernel,
        grid=(B // TB,),
        in_specs=[
            pl.BlockSpec((TB, P, C), lambda b: (b, 0, 0)),
            pl.BlockSpec((TB, Q, C), lambda b: (b, 0, 0)),
        ],
        out_specs=pl.BlockSpec((TB, P, Q), lambda b: (b, 0, 0)),
        out_shape=jax.ShapeDtypeStruct((B, P, Q), jnp.float32),
        compiler_params=pltpu.CompilerParams(dimension_semantics=("parallel",)),
    )(x, y)


# ---------------------------------------------------------------------------
# Channel-first conv glue (im2col feeding the lane-dense Pallas matmul)
# ---------------------------------------------------------------------------
def im2col3x3_cfirst(x_cf):
    """x_cf:(Cin,B,H,W) -> (Cin*9, B*H*W); K order = (cin, kh, kw), pad=1."""
    Cin, B, H, W = x_cf.shape
    xp = jnp.pad(x_cf, ((0, 0), (0, 0), (1, 1), (1, 1)))
    taps = [xp[:, :, kh:kh + H, kw:kw + W] for kh in range(3) for kw in range(3)]
    cols = jnp.stack(taps, axis=1)                           # (Cin, 9, B, H, W)
    return cols.reshape(Cin * 9, B * H * W)


# ---------------------------------------------------------------------------
# selective_matching_crossview forward
# ---------------------------------------------------------------------------
@functools.partial(jax.jit, static_argnums=(3, 4, 5, 6, 7))
def selective_matching_crossview_forward(lf_fea, agg1_w, agg2_w, an2, k_nbr,
                                         patch_size=4, candidate=9, stride=2):
    Ban2, c, H, W = lf_fea.shape
    N = Ban2 // an2
    ps = patch_size
    pnh, pnw = H // ps, W // ps
    Np = N * pnh * pnw
    C = c * ps * ps
    M = Ban2 * H * W

    def to_patch_q(x):
        # '(N an2) c (pnh psh) (pnw psw) -> (N pnh pnw) an2 (c psh psw)'
        x = x.reshape(N, an2, c, pnh, ps, pnw, ps)
        x = x.transpose(0, 3, 5, 1, 2, 4, 6)                 # (N,pnh,pnw,an2,c,psh,psw)
        return x.reshape(Np, an2, C)

    lf_patch = to_patch_q(lf_fea)                            # queries (Np, an2, C)

    # TODO(synk): generate the 9 shifted candidate views via in-kernel DMA /
    # index_map offsets instead of materializing 9 jnp.roll copies in HBM.
    length = int(candidate ** 0.5)
    radius = length // 2 - 1
    cand_list = []
    for i in range(candidate):
        x_shift = (i // length - radius) * stride
        y_shift = (i % length - radius) * stride
        shifted = jnp.roll(lf_fea, shift=(x_shift, y_shift), axis=(2, 3))
        cand_list.append(to_patch_q(shifted))
    # (Np, candidate*an2, C): used for the distance kernel AND the top-k gather.
    cand_all = jnp.stack(cand_list, axis=1).reshape(Np, candidate * an2, C)

    dist = euclidean_distance(lf_patch, cand_all)            # (Np, an2, cand*an2)

    # smallest-k neighbours (== torch.topk(..., largest=False, sorted=True))
    # TODO(synk): fuse this gather into the agg1 matmul via scalar-prefetched
    # indices (PrefetchScalarGridSpec) to avoid the k-times-inflated HBM tensor.
    _, idx = jax.lax.top_k(-dist, k_nbr)                     # (Np, an2, k)
    idx_flat = idx.reshape(Np, an2 * k_nbr)
    sel = jnp.take_along_axis(
        cand_all,
        jnp.broadcast_to(idx_flat[:, :, None], (Np, an2 * k_nbr, C)),
        axis=1)                                              # (Np, an2*k, C)

    # rearrange to channel-first matmul layout: (K=k*c, M=(N,an2,pnh,psh,pnw,psw))
    sel = sel.reshape(N, pnh, pnw, an2, k_nbr, c, ps, ps)
    sel = sel.transpose(4, 5, 0, 3, 1, 6, 2, 7)              # (k,c,N,an2,pnh,psh,pnw,psw)
    sel = sel.reshape(k_nbr * c, M)

    # agg1: 1x1 conv (no bias) + LeakyReLU(0.1)  -> (c, M) lane-dense
    agg1_out = matmul_act_lane(agg1_w, sel, slope=NEG_SLOPE)

    # agg2: concat([lf_fea, agg1_out], channel) -> 3x3 conv (pad=1, no bias) + LeakyReLU
    # TODO(synk): fuse the 3x3 im2col taps into the matmul kernel (9 shifted dot
    # accumulations on a padded block) to cut the 9x im2col HBM traffic.
    lf_cf = lf_fea.transpose(1, 0, 2, 3)                     # (c, B, H, W)
    a1_cf = agg1_out.reshape(c, Ban2, H, W)
    cols = jnp.concatenate(
        [im2col3x3_cfirst(lf_cf), im2col3x3_cfirst(a1_cf)], axis=0)   # (2c*9, M)
    w2 = agg2_w.reshape(agg2_w.shape[0], -1)                 # (c, 2c*9)
    out = matmul_act_lane(w2, cols, slope=NEG_SLOPE)         # (c, M)

    return out.reshape(c, Ban2, H, W).transpose(1, 0, 2, 3)  # NCHW


# ---------------------------------------------------------------------------
# Demo
# ---------------------------------------------------------------------------
if __name__ == "__main__":
    key = jax.random.PRNGKey(0)
    an = 2
    an2 = an * an
    channels = 8
    k_nbr = 4
    N = 1
    H = W = 16

    k1, k2, k3 = jax.random.split(key, 3)
    lf_fea = jax.random.normal(k1, (N * an2, channels, H, W), jnp.float32)
    agg1_w = jax.random.normal(k2, (channels, channels * k_nbr), jnp.float32) * 0.2
    agg2_w = jax.random.normal(k3, (channels, 2 * channels, 3, 3), jnp.float32) * 0.2

    out = selective_matching_crossview_forward(
        lf_fea, agg1_w, agg2_w, an2, k_nbr, 4, 9, 2)
    out = jax.block_until_ready(out)

    assert out.shape == (N * an2, channels, H, W)
    assert out.dtype == jnp.float32
    assert bool(jnp.all(jnp.isfinite(out)))
    print("KERNEL_OK")
</pallas_src>

<mosaic_0001>
module attributes {stable_mosaic.version = 11 : i64} {
  func.func @_euclid_kernel(%arg0: i32, %arg1: memref<16x4x128xf32, #tpu.memory_space<vmem>>, %arg2: memref<16x36x128xf32, #tpu.memory_space<vmem>>, %arg3: memref<16x4x36xf32, #tpu.memory_space<vmem>>) attributes {dimension_semantics = [#tpu.dimension_semantics<parallel>], iteration_bounds = array<i64: 1>, scalar_prefetch = 0 : i64, scratch_operands = 0 : i64, tpu.core_type = #tpu.core_type<tc>, window_params = [{transform_indices = @transform_0, window_bounds = array<i64: 16, 4, 128>}, {transform_indices = @transform_1, window_bounds = array<i64: 16, 36, 128>}, {transform_indices = @transform_2, window_bounds = array<i64: 16, 4, 36>}]} {
    %c0 = arith.constant 0 : index
    %c0_0 = arith.constant 0 : index
    %c0_1 = arith.constant 0 : index
    %0 = vector.load %arg1[%c0, %c0_0, %c0_1] : memref<16x4x128xf32, #tpu.memory_space<vmem>>, vector<16x4x128xf32>
    %c0_2 = arith.constant 0 : index
    %c0_3 = arith.constant 0 : index
    %c0_4 = arith.constant 0 : index
    %1 = vector.load %arg2[%c0_2, %c0_3, %c0_4] : memref<16x36x128xf32, #tpu.memory_space<vmem>>, vector<16x36x128xf32>
    %cst = arith.constant dense<0.000000e+00> : vector<16x4x36xf32>
    %2 = tpu.matmul %0, %1, %cst {dimension_numbers = #tpu.dot_dimension_numbers<[2], [2], [1], [1], [0, 0, 0, 1, 1, 1], [0], [0]>} : vector<16x4x128xf32>, vector<16x36x128xf32>, vector<16x4x36xf32> -> vector<16x4x36xf32>
    %cst_5 = arith.constant -2.000000e+00 : f32
    %3 = vector.broadcast %cst_5 : f32 to vector<16x4x36xf32>
    %4 = arith.mulf %3, %2 : vector<16x4x36xf32>
    %5 = arith.mulf %0, %0 : vector<16x4x128xf32>
    %cst_6 = arith.constant dense<0.000000e+00> : vector<16x4xf32>
    %6 = vector.multi_reduction <add>, %5, %cst_6 [2] : vector<16x4x128xf32> to vector<16x4xf32>
    %7 = vector.shape_cast %6 : vector<16x4xf32> to vector<16x4x1xf32>
    %8 = vector.broadcast %7 : vector<16x4x1xf32> to vector<16x4x36xf32>
    %9 = arith.addf %4, %8 : vector<16x4x36xf32>
    %10 = arith.mulf %1, %1 : vector<16x36x128xf32>
    %cst_7 = arith.constant dense<0.000000e+00> : vector<16x36xf32>
    %11 = vector.multi_reduction <add>, %10, %cst_7 [2] : vector<16x36x128xf32> to vector<16x36xf32>
    %12 = vector.shape_cast %11 : vector<16x36xf32> to vector<16x1x36xf32>
    %13 = vector.broadcast %12 : vector<16x1x36xf32> to vector<16x4x36xf32>
    %14 = arith.addf %9, %13 : vector<16x4x36xf32>
    %c0_8 = arith.constant 0 : index
    %c0_9 = arith.constant 0 : index
    %c0_10 = arith.constant 0 : index
    %15 = vector.load %arg3[%c0_8, %c0_9, %c0_10] : memref<16x4x36xf32, #tpu.memory_space<vmem>>, vector<16x4x36xf32>
    tpu.vector_store %arg3[%c0_8, %c0_9, %c0_10], %14 {strides = array<i32>} : memref<16x4x36xf32, #tpu.memory_space<vmem>>, vector<16x4x36xf32>,
    return
  }
  func.func @transform_0(%arg0: i32) -> (i32, i32, i32) {
    %c0_i32 = arith.constant 0 : i32
    %c0_i32_0 = arith.constant 0 : i32
    %c0_i32_1 = arith.constant 0 : i32
    return %arg0, %c0_i32, %c0_i32_0 : i32, i32, i32
  }
  func.func @transform_1(%arg0: i32) -> (i32, i32, i32) {
    %c0_i32 = arith.constant 0 : i32
    %c0_i32_0 = arith.constant 0 : i32
    %c0_i32_1 = arith.constant 0 : i32
    return %arg0, %c0_i32, %c0_i32_0 : i32, i32, i32
  }
  func.func @transform_2(%arg0: i32) -> (i32, i32, i32) {
    %c0_i32 = arith.constant 0 : i32
    %c0_i32_0 = arith.constant 0 : i32
    %c0_i32_1 = arith.constant 0 : i32
    return %arg0, %c0_i32, %c0_i32_0 : i32, i32, i32
  }
}

module attributes {stable_mosaic.version = 11 : i64} {
  func.func @_mm_act_kernel(%arg0: i32, %arg1: memref<8x32xf32, #tpu.memory_space<vmem>>, %arg2: memref<32x1024xf32, #tpu.memory_space<vmem>>, %arg3: memref<8x1024xf32, #tpu.memory_space<vmem>>) attributes {dimension_semantics = [#tpu.dimension_semantics<parallel>], iteration_bounds = array<i64: 1>, scalar_prefetch = 0 : i64, scratch_operands = 0 : i64, tpu.core_type = #tpu.core_type<tc>, window_params = [{pipeline_mode = #tpu.pipeline_mode<synchronous>, transform_indices = @transform_0, window_bounds = array<i64: 8, 32>}, {transform_indices = @transform_1, window_bounds = array<i64: 32, 1024>}, {transform_indices = @transform_2, window_bounds = array<i64: 8, 1024>}]} {
    %c0 = arith.constant 0 : index
    %c0_0 = arith.constant 0 : index
    %0 = vector.load %arg1[%c0, %c0_0] : memref<8x32xf32, #tpu.memory_space<vmem>>, vector<8x32xf32>
    %c0_1 = arith.constant 0 : index
    %c0_2 = arith.constant 0 : index
    %1 = vector.load %arg2[%c0_1, %c0_2] : memref<32x1024xf32, #tpu.memory_space<vmem>>, vector<32x1024xf32>
    %cst = arith.constant dense<0.000000e+00> : vector<8x1024xf32>
    %2 = tpu.matmul %0, %1, %cst {dimension_numbers = #tpu.dot_dimension_numbers<[1], [0], [0], [1], [0, 0, 1, 1], [], []>} : vector<8x32xf32>, vector<32x1024xf32>, vector<8x1024xf32> -> vector<8x1024xf32>
    %cst_3 = arith.constant 0.000000e+00 : f32
    %3 = vector.broadcast %cst_3 : f32 to vector<8x1024xf32>
    %4 = arith.cmpf oge, %2, %3 : vector<8x1024xf32>
    %cst_4 = arith.constant 1.000000e-01 : f32
    %5 = vector.broadcast %cst_4 : f32 to vector<8x1024xf32>
    %6 = arith.mulf %2, %5 : vector<8x1024xf32>
    %7 = arith.select %4, %2, %6 : vector<8x1024xi1>, vector<8x1024xf32>
    %c0_5 = arith.constant 0 : index
    %c0_6 = arith.constant 0 : index
    %8 = vector.load %arg3[%c0_5, %c0_6] : memref<8x1024xf32, #tpu.memory_space<vmem>>, vector<8x1024xf32>
    tpu.vector_store %arg3[%c0_5, %c0_6], %7 {strides = array<i32>} : memref<8x1024xf32, #tpu.memory_space<vmem>>, vector<8x1024xf32>,
    return
  }
  func.func @transform_0(%arg0: i32) -> (i32, i32) {
    %c0_i32 = arith.constant 0 : i32
    %c0_i32_0 = arith.constant 0 : i32
    %c0_i32_1 = arith.constant 0 : i32
    return %c0_i32, %c0_i32_0 : i32, i32
  }
  func.func @transform_1(%arg0: i32) -> (i32, i32) {
    %c0_i32 = arith.constant 0 : i32
    %c0_i32_0 = arith.constant 0 : i32
    return %c0_i32, %arg0 : i32, i32
  }
  func.func @transform_2(%arg0: i32) -> (i32, i32) {
    %c0_i32 = arith.constant 0 : i32
    %c0_i32_0 = arith.constant 0 : i32
    return %c0_i32, %arg0 : i32, i32
  }
}

module attributes {stable_mosaic.version = 11 : i64} {
  func.func @_mm_act_kernel(%arg0: i32, %arg1: memref<8x144xf32, #tpu.memory_space<vmem>>, %arg2: memref<144x1024xf32, #tpu.memory_space<vmem>>, %arg3: memref<8x1024xf32, #tpu.memory_space<vmem>>) attributes {dimension_semantics = [#tpu.dimension_semantics<parallel>], iteration_bounds = array<i64: 1>, scalar_prefetch = 0 : i64, scratch_operands = 0 : i64, tpu.core_type = #tpu.core_type<tc>, window_params = [{pipeline_mode = #tpu.pipeline_mode<synchronous>, transform_indices = @transform_0, window_bounds = array<i64: 8, 144>}, {transform_indices = @transform_1, window_bounds = array<i64: 144, 1024>}, {transform_indices = @transform_2, window_bounds = array<i64: 8, 1024>}]} {
    %c0 = arith.constant 0 : index
    %c0_0 = arith.constant 0 : index
    %0 = vector.load %arg1[%c0, %c0_0] : memref<8x144xf32, #tpu.memory_space<vmem>>, vector<8x144xf32>
    %c0_1 = arith.constant 0 : index
    %c0_2 = arith.constant 0 : index
    %1 = vector.load %arg2[%c0_1, %c0_2] : memref<144x1024xf32, #tpu.memory_space<vmem>>, vector<144x1024xf32>
    %cst = arith.constant dense<0.000000e+00> : vector<8x1024xf32>
    %2 = tpu.matmul %0, %1, %cst {dimension_numbers = #tpu.dot_dimension_numbers<[1], [0], [0], [1], [0, 0, 1, 1], [], []>} : vector<8x144xf32>, vector<144x1024xf32>, vector<8x1024xf32> -> vector<8x1024xf32>
    %cst_3 = arith.constant 0.000000e+00 : f32
    %3 = vector.broadcast %cst_3 : f32 to vector<8x1024xf32>
    %4 = arith.cmpf oge, %2, %3 : vector<8x1024xf32>
    %cst_4 = arith.constant 1.000000e-01 : f32
    %5 = vector.broadcast %cst_4 : f32 to vector<8x1024xf32>
    %6 = arith.mulf %2, %5 : vector<8x1024xf32>
    %7 = arith.select %4, %2, %6 : vector<8x1024xi1>, vector<8x1024xf32>
    %c0_5 = arith.constant 0 : index
    %c0_6 = arith.constant 0 : index
    %8 = vector.load %arg3[%c0_5, %c0_6] : memref<8x1024xf32, #tpu.memory_space<vmem>>, vector<8x1024xf32>
    tpu.vector_store %arg3[%c0_5, %c0_6], %7 {strides = array<i32>} : memref<8x1024xf32, #tpu.memory_space<vmem>>, vector<8x1024xf32>,
    return
  }
  func.func @transform_0(%arg0: i32) -> (i32, i32) {
    %c0_i32 = arith.constant 0 : i32
    %c0_i32_0 = arith.constant 0 : i32
    %c0_i32_1 = arith.constant 0 : i32
    return %c0_i32, %c0_i32_0 : i32, i32
  }
  func.func @transform_1(%arg0: i32) -> (i32, i32) {
    %c0_i32 = arith.constant 0 : i32
    %c0_i32_0 = arith.constant 0 : i32
    return %c0_i32, %arg0 : i32, i32
  }
  func.func @transform_2(%arg0: i32) -> (i32, i32) {
    %c0_i32 = arith.constant 0 : i32
    %c0_i32_0 = arith.constant 0 : i32
    return %c0_i32, %arg0 : i32, i32
  }
}

</mosaic_0001>

<bundles_post_ra>
// kernel: neg.1
= control target key start
LH: loop header
LB: loop body
LE: loop exit
PB: predicated region body
PF: predicated region fallthrough
CT: control target
= control target key end

     0   :  { %s264_s0 = inlined_call_operand.vmem [shape: f32[16,4,36], index: 0, kind: input, shape index: {}]   ;;  %s265_s1 = inlined_call_operand.vmem [shape: f32[16,4,36], index: 1, kind: output, shape index: {}]  }
   0x1   :  { %v2_v0 = vld [vmem:[%s264_s0] sm:$0xf]  ;;  %v128_v1 = vld [vmem:[%s264_s0 + $0x4] sm:$0xf]  ;;  %v130_v2 = vld [vmem:[%s264_s0 + $0x8] sm:$0xf] }
   0x2   :  { %v5_v3 = vxor.u32 2147483648, %v2_v0  ;;  %v12_v4 = vxor.u32 2147483648, %v128_v1  ;;  %v20_v5 = vxor.u32 2147483648, %v130_v2  ;;  %v132_v6 = vld [vmem:[%s264_s0 + $0xc] sm:$0xf] }
   0x3   :  { %v28_v7 = vxor.u32 2147483648, %v132_v6  ;;  %v134_v8 = vld [vmem:[%s264_s0 + $0x10] sm:$0xf]  ;;  %v136_v9 = vld [vmem:[%s264_s0 + $0x14] sm:$0xf] }
   0x4   :  { %7 = vst [vmem:[%s265_s1] sm:$0xf] %v5_v3  ;;  %129 = vst [vmem:[%s265_s1 + $0x4] sm:$0xf] %v12_v4  ;;  %v36_v10 = vxor.u32 2147483648, %v134_v8  ;;  %v44_v11 = vxor.u32 2147483648, %v136_v9 }
   0x5   :  { %131 = vst [vmem:[%s265_s1 + $0x8] sm:$0xf] %v20_v5  ;;  %v138_v12 = vld [vmem:[%s264_s0 + $0x18] sm:$0xf]  ;;  %v140_v13 = vld [vmem:[%s264_s0 + $0x1c] sm:$0xf] }
   0x6   :  { %133 = vst [vmem:[%s265_s1 + $0xc] sm:$0xf] %v28_v7  ;;  %v52_v14 = vxor.u32 2147483648, %v138_v12  ;;  %v60_v15 = vxor.u32 2147483648, %v140_v13  ;;  %v142_v16 = vld [vmem:[%s264_s0 + $0x20] sm:$0xf] }
   0x7   :  { %v144_v17 = vld [vmem:[%s264_s0 + $0x24] sm:$0xf]  ;;  %135 = vst [vmem:[%s265_s1 + $0x10] sm:$0xf] %v36_v10  ;;  %137 = vst [vmem:[%s265_s1 + $0x14] sm:$0xf] %v44_v11 }
   0x8   :  { %v68_v18 = vxor.u32 2147483648, %v142_v16  ;;  %v76_v19 = vxor.u32 2147483648, %v144_v17  ;;  %v146_v20 = vld [vmem:[%s264_s0 + $0x28] sm:$0xf]  ;;  %v148_v21 = vld [vmem:[%s264_s0 + $0x2c] sm:$0xf] }
   0x9   :  { %139 = vst [vmem:[%s265_s1 + $0x18] sm:$0xf] %v52_v14  ;;  %141 = vst [vmem:[%s265_s1 + $0x1c] sm:$0xf] %v60_v15  ;;  %v84_v22 = vxor.u32 2147483648, %v146_v20  ;;  %v92_v23 = vxor.u32 2147483648, %v148_v21 }
   0xa   :  { %v150_v24 = vld [vmem:[%s264_s0 + $0x30] sm:$0xf]  ;;  %v152_v25 = vld [vmem:[%s264_s0 + $0x34] sm:$0xf]  ;;  %143 = vst [vmem:[%s265_s1 + $0x20] sm:$0xf] %v68_v18 }
   0xb   :  { %145 = vst [vmem:[%s265_s1 + $0x24] sm:$0xf] %v76_v19  ;;  %v100_v26 = vxor.u32 2147483648, %v150_v24  ;;  %v108_v27 = vxor.u32 2147483648, %v152_v25  ;;  %v154_v28 = vld [vmem:[%s264_s0 + $0x38] sm:$0xf] }
   0xc   :  { %v156_v29 = vld [vmem:[%s264_s0 + $0x3c] sm:$0xf]  ;;  %147 = vst [vmem:[%s265_s1 + $0x28] sm:$0xf] %v84_v22  ;;  %149 = vst [vmem:[%s265_s1 + $0x2c] sm:$0xf] %v92_v23 }
   0xd   :  { %v116_v30 = vxor.u32 2147483648, %v154_v28  ;;  %v124_v31 = vxor.u32 2147483648, %v156_v29  ;;  %151 = vst [vmem:[%s265_s1 + $0x30] sm:$0xf] %v100_v26  ;;  %153 = vst [vmem:[%s265_s1 + $0x34] sm:$0xf] %v108_v27 }
   0xf   :  { %155 = vst [vmem:[%s265_s1 + $0x38] sm:$0xf] %v116_v30  ;;  %157 = vst [vmem:[%s265_s1 + $0x3c] sm:$0xf] %v124_v31 }

// kernel: selective_matching_crossview_forward.3
= control target key start
LH: loop header
LB: loop body
LE: loop exit
PB: predicated region body
PF: predicated region fallthrough
CT: control target
= control target key end

     0   :  { %vm1259_vm0 = vcmask 1043456   ;;  %v2447_v0 = vmov 0.0   ;;  %vm2448_vm1 = vmmov 0   ;;  %vm1671_vm2 = vcmask 130112   ;;  %s3673_s1 = inlined_call_operand.vmem [shape: f32[16,36,128], index: 1, kind: input, shape index: {}]   ;;  %s3674_s0 = inlined_call_operand.vmem [shape: f32[16,4,128], index: 0, kind: input, shape index: {}]   ;;  %s3675_s2 = inlined_call_operand.vmem [shape: f32[16,4,36], index: 2, kind: output, shape index: {}]  }
   0x1   :  { %2237 = vmatprep.subr.mxu0 %v2447_v0  ;;  %2250 = vmatprep.subr.mxu1 %v2447_v0  ;;  %v2469_v1 = vld [vmem:[%s3673_s1 + $0x20] sm:$0xf]  ;;  %v2474_v2 = vld [vmem:[%s3673_s1 + $0x48] sm:$0xf]  ;;  %v2497_v7 = vld [vmem:[%s3673_s1 + $0x18] sm:$0xff]  ;;  %vm1678_vm3 = vcmask 195712  }
   0x2   :  { %v2479_v3 = vld [vmem:[%s3674_s0 + $0x8] sm:$0xf]  ;;  %2238 = vmatpush3.xpose.msra.mxu0 %v2469_v1  ;;  %2251 = vmatpush3.xpose.msra.mxu1 %v2474_v2  ;;  %v2488_v5 = vld [vmem:[%s3674_s0] sm:$0xf]  ;;  %v2502_v8 = vld [vmem:[%s3674_s0 + $0xc] sm:$0xf] }
   0x3   :  { %v1245_v4 = vmul.f32 %v2479_v3, %v2479_v3  ;;  %2239 = vmatprep.subr.mxu0 %v2447_v0  ;;  %2252 = vmatprep.subr.mxu1 %v2447_v0  ;;  %v1243_v6 = vmul.f32 %v2488_v5, %v2488_v5  ;;  %v2507_v9 = vld [vmem:[%s3674_s0 + $0x4] sm:$0xf]  ;;  %v1246_v12 = vmul.f32 %v2502_v8, %v2502_v8  ;;  %v2522_v14 = vld [vmem:[%s3674_s0 + $0x14] sm:$0xf]  ;;  %v2527_v15 = vld [vmem:[%s3674_s0 + $0x10] sm:$0xf] }
   0x4   :  { %v2513_v11 = vld [vmem:[%s3673_s1 + $0x40] sm:$0xff]  ;;  %v1244_v13 = vmul.f32 %v2507_v9, %v2507_v9  ;;  %2247 = vmatprep.mubr.msk.f32.mxu0 %vm2448_vm1, %v2447_v0  ;;  %2260 = vmatprep.mubr.msk.f32.mxu1 %vm2448_vm1, %v2447_v0  ;;  %v1248_v18 = vmul.f32 %v2522_v14, %v2522_v14  ;;  %v2544_v20 = vld [vmem:[%s3673_s1 + $0x10] sm:$0xff]  ;;  %v1247_v21 = vmul.f32 %v2527_v15, %v2527_v15  ;;  %v2551_v22 = vld [vmem:[%s3674_s0 + $0x1c] sm:$0xf]  ;;  %vm1685_vm4 = vcmask 261312  }
   0x5   :  { %v1266_v10 = vsel %vm1259_vm0, %v1245_v4, 0.0  ;;  %v1260_v16 = vsel %vm1259_vm0, %v1243_v6, 0.0  ;;  %v1269_v17 = vsel %vm1259_vm0, %v1246_v12, 0.0  ;;  %v2557_v23 = vld [vmem:[%s3673_s1 + $0x38] sm:$0xff]  ;;  %v1250_v26 = vmul.f32 %v2551_v22, %v2551_v22  ;;  %v2574_v28 = vld [vmem:[%s3673_s1 + $0x8] sm:$0xff]  ;;  %v2587_v31 = vld [vmem:[%s3673_s1 + $0x30] sm:$0xff] }
   0x6   :  { %1267 = vadd.xlane.f32.xlu1 %v1266_v10  ;;  %1261 = vadd.xlane.f32.xlu0 %v1260_v16  ;;  %v1263_v19 = vsel %vm1259_vm0, %v1244_v13, 0.0  ;;  %v2562_v24 = vld [vmem:[%s3674_s0 + $0x18] sm:$0xf]  ;;  %v1275_v25 = vsel %vm1259_vm0, %v1248_v18, 0.0  ;;  %v1272_v27 = vsel %vm1259_vm0, %v1247_v21, 0.0  ;;  %v27_v36 = vld [vmem:[%s3673_s1] sm:$0xff]  ;;  %v1327_v16 = vmul.f32 %v2497_v7, %v2497_v7 }
   0x7   :  { %2240 = vmatpush3.xpose.msra.mxu0 %v2497_v7  ;;  %2253 = vmatpush3.xpose.msra.mxu1 %v2513_v11  ;;  %v1249_v29 = vmul.f32 %v2562_v24, %v2562_v24  ;;  %v2581_v30 = vld [vmem:[%s3674_s0 + $0x24] sm:$0xf]  ;;  %v2592_v32 = vld [vmem:[%s3674_s0 + $0x20] sm:$0xf]  ;;  %v1281_v33 = vsel %vm1259_vm0, %v1250_v26, 0.0  ;;  %v2615_v39 = vld [vmem:[%s3673_s1 + $0x28] sm:$0xff]  ;;  %v1324_v10 = vmul.f32 %v27_v36, %v27_v36  ;;  %v1328_v18 = vmul.f32 %v2469_v1, %v2469_v1 }
   0x8   :  { %2241 = vmatprep.subr.mxu0 %v2447_v0  ;;  %2254 = vmatprep.subr.mxu1 %v2447_v0  ;;  %v1252_v34 = vmul.f32 %v2581_v30, %v2581_v30  ;;  %v1251_v37 = vmul.f32 %v2592_v32, %v2592_v32  ;;  %v2609_v38 = vld [vmem:[%s3674_s0 + $0x2c] sm:$0xf]  ;;  %v2620_v40 = vld [vmem:[%s3674_s0 + $0x28] sm:$0xf]  ;;  %v2633_v45 = vld [vmem:[%s3674_s0 + $0x34] sm:$0xf]  ;;  %v1329_v1 = vmul.f32 %v2615_v39, %v2615_v39 }
   0x9   :  { %v1278_v35 = vsel %vm1259_vm0, %v1249_v29, 0.0  ;;  %v1254_v42 = vmul.f32 %v2609_v38, %v2609_v38  ;;  %v1253_v44 = vmul.f32 %v2620_v40, %v2620_v40  ;;  %v2639_v46 = vld [vmem:[%s3673_s1 + $0x70] sm:$0xf]  ;;  %v2644_v47 = vld [vmem:[%s3673_s1 + $0x98] sm:$0xf]  ;;  %v1256_v50 = vmul.f32 %v2633_v45, %v2633_v45  ;;  %v2671_v54 = vld [vmem:[%s3673_s1 + $0x68] sm:$0xff] }
   0xa   :  { %1270 = vadd.xlane.f32.xlu1 %v1269_v17  ;;  %1264 = vadd.xlane.f32.xlu0 %v1263_v19  ;;  %v1287_v41 = vsel %vm1259_vm0, %v1252_v34, 0.0  ;;  %v1284_v43 = vsel %vm1259_vm0, %v1251_v37, 0.0  ;;  %v2649_v48 = vld [vmem:[%s3674_s0 + $0x30] sm:$0xf]  ;;  %v2664_v53 = vld [vmem:[%s3674_s0 + $0x3c] sm:$0xf]  ;;  %v1326_v17 = vmul.f32 %v2544_v20, %v2544_v20  ;;  %v1330_v26 = vmul.f32 %v2587_v31, %v2587_v31 }
   0xb   :  { %2242 = vmatpush3.xpose.msra.mxu0 %v2544_v20  ;;  %2255 = vmatpush3.xpose.msra.mxu1 %v2557_v23  ;;  %v1293_v49 = vsel %vm1259_vm0, %v1254_v42, 0.0  ;;  %v1290_v51 = vsel %vm1259_vm0, %v1253_v44, 0.0  ;;  %v1255_v52 = vmul.f32 %v2649_v48, %v2649_v48  ;;  %v2676_v55 = vld [vmem:[%s3673_s1 + $0x90] sm:$0xff]  ;;  %v2681_v56 = vld [vmem:[%s3674_s0 + $0x38] sm:$0xf]  ;;  %v1299_v57 = vsel %vm1259_vm0, %v1256_v50, 0.0 }
   0xc   :  { %2243 = vmatprep.subr.mxu0 %v2447_v0  ;;  %2256 = vmatprep.subr.mxu1 %v2447_v0  ;;  %v1258_v58 = vmul.f32 %v2664_v53, %v2664_v53  ;;  %v1257_v60 = vmul.f32 %v2681_v56, %v2681_v56  ;;  %v2700_v61 = vld [vmem:[%s3673_s1 + $0x60] sm:$0xff]  ;;  %v2705_v62 = vld [vmem:[%s3673_s1 + $0x88] sm:$0xff]  ;;  %v37_v12 = vld [vmem:[%s3673_s1 + $0x50] sm:$0xff]  ;;  %v1412_v20 = vsel %vm1259_vm0, %v1328_v18, 0.0  ;;  %vm1692_vm5 = vcmask 326912  }
   0xd   :  { %v1296_v59 = vsel %vm1259_vm0, %v1255_v52, 0.0  ;;  %v2719_v6 = vld [vmem:[%s3673_s1 + $0x80] sm:$0xff]  ;;  %v2732_v13 = vld [vmem:[%s3673_s1 + $0x78] sm:$0xff]  ;;  %v2746_v19 = vld [vmem:[%s3673_s1 + $0xe8] sm:$0xf]  ;;  %v1334_v37 = vmul.f32 %v37_v12, %v37_v12  ;;  %v1337_v52 = vmul.f32 %v2671_v54, %v2671_v54  ;;  %vm2120_vm6 = vcmask 289792  }
   0xe   :  { %1276 = vadd.xlane.f32.xlu1 %v1275_v25  ;;  %1273 = vadd.xlane.f32.xlu0 %v1272_v27  ;;  %v1305_v63 = vsel %vm1259_vm0, %v1258_v58, 0.0  ;;  %v1302_v4 = vsel %vm1259_vm0, %v1257_v60, 0.0  ;;  %v2751_v7 = vld [vmem:[%s3673_s1 + $0xc0] sm:$0xf]  ;;  %v1333_v25 = vmul.f32 %v2474_v2, %v2474_v2  ;;  %v2788_v2 = vld [vmem:[%s3673_s1 + $0xd8] sm:$0xff]  ;;  %v2823_v34 = vld [vmem:[%s3673_s1 + $0xa8] sm:$0xff]  ;;  %v1338_v60 = vmul.f32 %v2639_v46, %v2639_v46 }
   0xf   :  { %2244 = vmatpush3.xpose.msra.mxu0 %v2574_v28  ;;  %2257 = vmatpush3.xpose.msra.mxu1 %v2587_v31  ;;  %v2764_v21 = vld [vmem:[%s3673_s1 + $0xe0] sm:$0xff]  ;;  %v2803_v29 = vld [vmem:[%s3673_s1 + $0x188] sm:$0xf]  ;;  %v2810_v31 = vld [vmem:[%s3673_s1 + $0xd0] sm:$0xff] }
  0x10   :  { %2245 = vmatprep.subr.mxu0 %v2447_v0  ;;  %2258 = vmatprep.subr.mxu1 %v2447_v0  ;;  %v1423_v27 = vsel %vm1259_vm0, %v1333_v25, 0.0  ;;  %v2839_v42 = vld [vmem:[%s3673_s1 + $0x1d8] sm:$0xf]  ;;  %v2849_v44 = vld [vmem:[%s3673_s1 + $0xc8] sm:$0xff]  ;;  %v1343_v25 = vmul.f32 %v2644_v47, %v2644_v47 }
  0x12   :  { %1282 = vadd.xlane.f32.xlu1 %v1281_v33  ;;  %1279 = vadd.xlane.f32.xlu0 %v1278_v35  ;;  %v1373_v33 = vmul.f32 %v2803_v29, %v2803_v29 }
  0x13   :  { %2246 = vmatpush3.xpose.msra.mxu0 %v27_v36  ;;  %2259 = vmatpush3.xpose.msra.mxu1 %v2615_v39 }
  0x14   :  { %2263 = vmatprep.subr.mxu0 %v2447_v0  ;;  %2276 = vmatprep.subr.mxu1 %v2447_v0  ;;  %v2828_v39 = vsel %vm1259_vm0, %v1373_v33, 0.0  ;;  %v2976_v33 = vld [vmem:[%s3673_s1 + $0x120] sm:$0xff] }
  0x16   :  { %1288 = vadd.xlane.f32.xlu1 %v1287_v41  ;;  %2248 = vmatmul.mubr.f32.vlgmr.msra.gmra.mxu0 %v2488_v5  ;;  %v38_v5 = vld [vmem:[%s3673_s1 + $0x58] sm:$0xff]  ;;  %v2834_v41 = vld [vmem:[%s3673_s1 + $0x1b0] sm:$0xf] }
  0x17   :  { %2261 = vmatmul.mubr.f32.vlgmr.msra.gmra.mxu1 %v2507_v9  ;;  %1285 = vadd.xlane.f32.xlu0 %v1284_v43  ;;  %v1325_v9 = vmul.f32 %v2574_v28, %v2574_v28  ;;  %v1332_v28 = vmul.f32 %v2513_v11, %v2513_v11  ;;  %v2815_v11 = vld [vmem:[%s3673_s1 + $0x160] sm:$0xf]  ;;  %v1335_v35 = vmul.f32 %v38_v5, %v38_v5 }
  0x18   :  { %2264 = vmatpush3.xpose.msra.mxu0 %v2639_v46  ;;  %2277 = vmatpush3.xpose.msra.mxu1 %v2644_v47  ;;  %v1368_v36 = vmul.f32 %v2815_v11, %v2815_v11  ;;  %v1378_v50 = vmul.f32 %v2834_v41, %v2834_v41  ;;  %v2959_v47 = vld [vmem:[%s3673_s1 + $0x128] sm:$0xff] }
  0x19   :  { %2278 = vmatprep.subr.mxu1 %v2447_v0  ;;  %2265 = vmatprep.subr.mxu0 %v2447_v0 }
  0x1a   :  { %1294 = vadd.xlane.f32.xlu1 %v1293_v49  ;;  %2273 = vmatprep.mubr.msk.f32.mxu0 %vm2448_vm1, %v2447_v0  ;;  %v2842_v43 = vsel %vm1259_vm0, %v1368_v36, 0.0  ;;  %v1383_v49 = vmul.f32 %v2839_v42, %v2839_v42 }
  0x1b   :  { %1291 = vadd.xlane.f32.xlu0 %v1290_v51  ;;  %2286 = vmatprep.mubr.msk.f32.mxu1 %vm2448_vm1, %v2447_v0  ;;  %v47_v51 = vld [vmem:[%s3673_s1 + $0xa0] sm:$0xff] }
  0x1c   :  { %2266 = vmatpush3.xpose.msra.mxu0 %v2671_v54  ;;  %2279 = vmatpush3.xpose.msra.mxu1 %v2676_v55  ;;  %v2864_v58 = vsel %vm1259_vm0, %v1383_v49, 0.0  ;;  %v2880_v54 = vld [vmem:[%s3673_s1 + $0x228] sm:$0xf]  ;;  %v1344_v36 = vmul.f32 %v47_v51, %v47_v51  ;;  %v57_v49 = vld [vmem:[%s3673_s1 + $0xf0] sm:$0xff] }
  0x1d   :  { %2280 = vmatprep.subr.mxu1 %v2447_v0  ;;  %2267 = vmatprep.subr.mxu0 %v2447_v0  ;;  %v1393_v46 = vmul.f32 %v2880_v54, %v2880_v54 }
  0x1e   :  { %1300 = vadd.xlane.f32.xlu1 %v1299_v57  ;;  %v1336_v57 = vmul.f32 %v2700_v61, %v2700_v61 }
  0x1f   :  { %1297 = vadd.xlane.f32.xlu0 %v1296_v59  ;;  %v2867_v59 = vsel %vm1259_vm0, %v1378_v50, 0.0 }
  0x20   :  { %2268 = vmatpush3.xpose.msra.mxu0 %v2700_v61  ;;  %2281 = vmatpush3.xpose.msra.mxu1 %v2705_v62  ;;  %v2886_v61 = vld [vmem:[%s3673_s1 + $0x138] sm:$0xf] }
  0x21   :  { %2282 = vmatprep.subr.mxu1 %v2447_v0  ;;  %2269 = vmatprep.subr.mxu0 %v2447_v0 }
  0x22   :  { %1306 = vadd.xlane.f32.xlu1 %v1305_v63  ;;  %v2875_v63 = vld [vmem:[%s3673_s1 + $0x200] sm:$0xf] }
  0x23   :  { %1303 = vadd.xlane.f32.xlu0 %v1302_v4  ;;  %v1388_v4 = vmul.f32 %v2875_v63, %v2875_v63 }
  0x24   :  { %2270 = vmatpush3.xpose.msra.mxu0 %v38_v5  ;;  %2283 = vmatpush3.xpose.msra.mxu1 %v2719_v6  ;;  %v2896_v5 = vld [vmem:[%s3673_s1 + $0x110] sm:$0xf] }
  0x25   :  { %2284 = vmatprep.subr.mxu1 %v2447_v0  ;;  %2271 = vmatprep.subr.mxu0 %v2447_v0 }
  0x26   :  { %1406 = vadd.xlane.f32.xlu1 %v1325_v9  ;;  %v1339_v9 = vmul.f32 %v2732_v13, %v2732_v13 }
  0x27   :  { %1404 = vadd.xlane.f32.xlu0 %v1324_v10  ;;  %v2902_v10 = vsel %vm1259_vm0, %v1393_v46, 0.0  ;;  %v72_v46 = vld [vmem:[%s3673_s1 + $0x168] sm:$0xff] }
  0x28   :  { %2272 = vmatpush3.xpose.msra.mxu0 %v37_v12  ;;  %2285 = vmatpush3.xpose.msra.mxu1 %v2732_v13  ;;  %v2905_v12 = vsel %vm1259_vm0, %v1388_v4, 0.0  ;;  %v67_v4 = vld [vmem:[%s3673_s1 + $0x140] sm:$0xff] }
  0x29   :  { %2302 = vmatprep.subr.mxu1 %v2447_v0  ;;  %2289 = vmatprep.subr.mxu0 %v2447_v0 }
  0x2a   :  { %1410 = vadd.xlane.f32.xlu1 %v1327_v16  ;;  %v1434_v16 = vsel %vm1259_vm0, %v1338_v60, 0.0 }
  0x2b   :  { %2287 = vmatmul.mubr.f32.vlgmr.msra.gmra.mxu1 %v2502_v8  ;;  %1408 = vadd.xlane.f32.xlu0 %v1326_v17  ;;  %v1331_v8 = vmul.f32 %v2557_v23, %v2557_v23  ;;  %v2794_v23 = vld [vmem:[%s3673_s1 + $0xb0] sm:$0xff]  ;;  %v2913_v17 = vld [vmem:[%s3673_s1 + $0x278] sm:$0xf] }
  0x2c   :  { %2274 = vmatmul.mubr.f32.vlgmr.msra.gmra.mxu0 %v2479_v3  ;;  %2303 = vmatpush3.xpose.msra.mxu1 %v2746_v19  ;;  %v2770_v3 = vld [vmem:[%s3673_s1 + $0xb8] sm:$0xff]  ;;  %v1403_v13 = vmul.f32 %v2913_v17, %v2913_v17  ;;  %v1346_v50 = vmul.f32 %v2794_v23, %v2794_v23 }
  0x2d   :  { %2290 = vmatpush3.xpose.msra.mxu0 %v2751_v7  ;;  %2304 = vmatprep.subr.mxu1 %v2447_v0 }
  0x2e   :  { %1415 = vadd.xlane.f32.xlu1 %v1329_v1  ;;  %2291 = vmatprep.subr.mxu0 %v2447_v0  ;;  %v2935_v1 = vld [vmem:[%s3673_s1 + $0x108] sm:$0xff] }
  0x2f   :  { %1413 = vadd.xlane.f32.xlu0 %v1412_v20  ;;  %2299 = vmatprep.mubr.msk.f32.mxu0 %vm2448_vm1, %v2447_v0  ;;  %v1341_v20 = vmul.f32 %v2705_v62, %v2705_v62  ;;  %v2965_v62 = vld [vmem:[%s3673_s1 + $0x100] sm:$0xff] }
  0x30   :  { %2305 = vmatpush3.xpose.msra.mxu1 %v2764_v21  ;;  %2312 = vmatprep.mubr.msk.f32.mxu1 %vm2448_vm1, %v2447_v0 }
  0x31   :  { %2292 = vmatpush3.xpose.msra.mxu0 %v2770_v3  ;;  %2306 = vmatprep.subr.mxu1 %v2447_v0 }
  0x32   :  { %1419 = vadd.xlane.f32.xlu1 %v1331_v8  ;;  %2293 = vmatprep.subr.mxu0 %v2447_v0  ;;  %v1340_v8 = vmul.f32 %v2719_v6, %v2719_v6  ;;  %v1445_v6 = vsel %vm1259_vm0, %v1343_v25, 0.0 }
  0x33   :  { %1417 = vadd.xlane.f32.xlu0 %v1330_v26  ;;  %v2946_v26 = vsel %vm1259_vm0, %v1403_v13, 0.0  ;;  %v1358_v13 = vmul.f32 %v2896_v5, %v2896_v5 }
  0x34   :  { %2307 = vmatpush3.xpose.msra.mxu1 %v2788_v2 }
  0x35   :  { %2294 = vmatpush3.xpose.msra.mxu0 %v2794_v23  ;;  %2308 = vmatprep.subr.mxu1 %v2447_v0  ;;  %v1350_v23 = vmul.f32 %v2810_v31, %v2810_v31 }
  0x36   :  { %1424 = vadd.xlane.f32.xlu1 %v1423_v27  ;;  %2295 = vmatprep.subr.mxu0 %v2447_v0 }
  0x37   :  { %1421 = vadd.xlane.f32.xlu0 %v1332_v28  ;;  %v1342_v28 = vmul.f32 %v2676_v55, %v2676_v55  ;;  %v1345_v55 = vmul.f32 %v2823_v34, %v2823_v34 }
  0x38   :  { %2309 = vmatpush3.xpose.msra.mxu1 %v2810_v31 }
  0x39   :  { %2296 = vmatpush3.xpose.msra.mxu0 %v2823_v34  ;;  %2310 = vmatprep.subr.mxu1 %v2447_v0  ;;  %v1347_v34 = vmul.f32 %v2770_v3, %v2770_v3 }
  0x3a   :  { %1428 = vadd.xlane.f32.xlu1 %v1335_v35  ;;  %2297 = vmatprep.subr.mxu0 %v2447_v0  ;;  %v58_v35 = vld [vmem:[%s3673_s1 + $0xf8] sm:$0xff] }
  0x3b   :  { %1426 = vadd.xlane.f32.xlu0 %v1334_v37  ;;  %v2989_v37 = vld [vmem:[%s3673_s1 + $0x118] sm:$0xff]  ;;  %v1355_v60 = vmul.f32 %v58_v35, %v58_v35 }
  0x3c   :  { %2311 = vmatpush3.xpose.msra.mxu1 %v2849_v44 }
  0x3d   :  { %2298 = vmatpush3.xpose.msra.mxu0 %v47_v51  ;;  %2328 = vmatprep.subr.mxu1 %v2447_v0  ;;  %v1348_v51 = vmul.f32 %v2751_v7, %v2751_v7  ;;  %v3015_v7 = vld [vmem:[%s3673_s1 + $0x180] sm:$0xff] }
  0x3e   :  { %1432 = vadd.xlane.f32.xlu1 %v1337_v52  ;;  %2315 = vmatprep.subr.mxu0 %v2447_v0  ;;  %v1349_v52 = vmul.f32 %v2849_v44, %v2849_v44  ;;  %v3056_v44 = vld [vmem:[%s3673_s1 + $0x170] sm:$0xff] }
  0x3f   :  { %2313 = vmatmul.mubr.f32.vlgmr.msra.gmra.mxu1 %v2522_v14  ;;  %1430 = vadd.xlane.f32.xlu0 %v1336_v57  ;;  %v2918_v14 = vld [vmem:[%s3673_s1 + $0x250] sm:$0xf]  ;;  %v1456_v3 = vsel %vm1259_vm0, %v1348_v51, 0.0  ;;  %v68_v57 = vld [vmem:[%s3673_s1 + $0x148] sm:$0xff] }
  0x40   :  { %2300 = vmatmul.mubr.f32.vlgmr.msra.gmra.mxu0 %v2527_v15  ;;  %2329 = vmatpush3.xpose.msra.mxu1 %v2886_v61  ;;  %v2925_v15 = vld [vmem:[%s3673_s1 + $0x130] sm:$0xff]  ;;  %v1398_v18 = vmul.f32 %v2918_v14, %v2918_v14 }
  0x41   :  { %2316 = vmatpush3.xpose.msra.mxu0 %v2896_v5  ;;  %2330 = vmatprep.subr.mxu1 %v2447_v0  ;;  %v3090_v5 = vld [vmem:[%s3673_s1 + $0x1d0] sm:$0xff]  ;;  %v1362_v25 = vmul.f32 %v2925_v15, %v2925_v15 }
  0x42   :  { %1437 = vadd.xlane.f32.xlu1 %v1339_v9  ;;  %2317 = vmatprep.subr.mxu0 %v2447_v0  ;;  %v2949_v27 = vsel %vm1259_vm0, %v1398_v18, 0.0  ;;  %v1357_v9 = vmul.f32 %v2935_v1, %v2935_v1  ;;  %v1359_v18 = vmul.f32 %v2989_v37, %v2989_v37  ;;  %v3185_v51 = vld [vmem:[%s3673_s1 + $0x1f0] sm:$0xff] }
  0x43   :  { %1435 = vadd.xlane.f32.xlu0 %v1434_v16  ;;  %2325 = vmatprep.mubr.msk.f32.mxu0 %vm2448_vm1, %v2447_v0  ;;  %v1356_v16 = vmul.f32 %v2965_v62, %v2965_v62 }
  0x44   :  { %2331 = vmatpush3.xpose.msra.mxu1 %v2925_v15  ;;  %2338 = vmatprep.mubr.msk.f32.mxu1 %vm2448_vm1, %v2447_v0  ;;  %v1364_v15 = vmul.f32 %v67_v4, %v67_v4 }
  0x45   :  { %2318 = vmatpush3.xpose.msra.mxu0 %v2935_v1  ;;  %2332 = vmatprep.subr.mxu1 %v2447_v0  ;;  %v1478_v1 = vsel %vm1259_vm0, %v1358_v13, 0.0 }
  0x46   :  { %1441 = vadd.xlane.f32.xlu1 %v1341_v20  ;;  %2319 = vmatprep.subr.mxu0 %v2447_v0  ;;  %v3114_v20 = vld [vmem:[%s3673_s1 + $0x1c8] sm:$0xff] }
  0x47   :  { %1439 = vadd.xlane.f32.xlu0 %v1340_v8 }
  0x48   :  { %2333 = vmatpush3.xpose.msra.mxu1 %v2959_v47 }
  0x49   :  { %2320 = vmatpush3.xpose.msra.mxu0 %v2965_v62  ;;  %2334 = vmatprep.subr.mxu1 %v2447_v0  ;;  %v78_v62 = vld [vmem:[%s3673_s1 + $0x198] sm:$0xff] }
  0x4a   :  { %1446 = vadd.xlane.f32.xlu1 %v1445_v6  ;;  %2321 = vmatprep.subr.mxu0 %v2447_v0  ;;  %v1365_v6 = vmul.f32 %v68_v57, %v68_v57 }
  0x4b   :  { %1443 = vadd.xlane.f32.xlu0 %v1342_v28  ;;  %v82_v28 = vld [vmem:[%s3673_s1 + $0x1b8] sm:$0xff] }
  0x4c   :  { %2335 = vmatpush3.xpose.msra.mxu1 %v2976_v33 }
  0x4d   :  { %2322 = vmatpush3.xpose.msra.mxu0 %v58_v35  ;;  %2336 = vmatprep.subr.mxu1 %v2447_v0  ;;  %v1370_v35 = vmul.f32 %v3056_v44, %v3056_v44 }
  0x4e   :  { %1450 = vadd.xlane.f32.xlu1 %v1345_v55  ;;  %2323 = vmatprep.subr.mxu0 %v2447_v0  ;;  %v1369_v55 = vmul.f32 %v72_v46, %v72_v46 }
  0x4f   :  { %1448 = vadd.xlane.f32.xlu0 %v1344_v36  ;;  %v1375_v36 = vmul.f32 %v78_v62, %v78_v62 }
  0x50   :  { %2337 = vmatpush3.xpose.msra.mxu1 %v2989_v37 }
  0x51   :  { %2324 = vmatpush3.xpose.msra.mxu0 %v57_v49  ;;  %2354 = vmatprep.subr.mxu1 %v2447_v0 }
  0x52   :  { %1454 = vadd.xlane.f32.xlu1 %v1347_v34  ;;  %2341 = vmatprep.subr.mxu0 %v2447_v0  ;;  %v87_v34 = vld [vmem:[%s3673_s1 + $0x1e0] sm:$0xff] }
  0x53   :  { %2339 = vmatmul.mubr.f32.vlgmr.msra.gmra.mxu1 %v2551_v22  ;;  %1452 = vadd.xlane.f32.xlu0 %v1346_v50  ;;  %v3021_v22 = vld [vmem:[%s3673_s1 + $0x158] sm:$0xff] }
  0x54   :  { %2326 = vmatmul.mubr.f32.vlgmr.msra.gmra.mxu0 %v2562_v24  ;;  %2355 = vmatpush3.xpose.msra.mxu1 %v2803_v29  ;;  %v1351_v24 = vmul.f32 %v2788_v2, %v2788_v2  ;;  %v1353_v29 = vmul.f32 %v2746_v19, %v2746_v19  ;;  %v3039_v2 = vld [vmem:[%s3673_s1 + $0x178] sm:$0xff]  ;;  %v3045_v19 = vld [vmem:[%s3673_s1 + $0x150] sm:$0xff] }
  0x55   :  { %2342 = vmatpush3.xpose.msra.mxu0 %v2815_v11  ;;  %2356 = vmatprep.subr.mxu1 %v2447_v0  ;;  %v1352_v11 = vmul.f32 %v2764_v21, %v2764_v21  ;;  %v1354_v21 = vmul.f32 %v57_v49, %v57_v49  ;;  %v3155_v49 = vld [vmem:[%s3673_s1 + $0x220] sm:$0xff]  ;;  %v3179_v50 = vld [vmem:[%s3673_s1 + $0x218] sm:$0xff] }
  0x56   :  { %1459 = vadd.xlane.f32.xlu1 %v1349_v52  ;;  %2343 = vmatprep.subr.mxu0 %v2447_v0  ;;  %v1467_v31 = vsel %vm1259_vm0, %v1353_v29, 0.0 }
  0x57   :  { %1457 = vadd.xlane.f32.xlu0 %v1456_v3  ;;  %2351 = vmatprep.mubr.msk.f32.mxu0 %vm2448_vm1, %v2447_v0  ;;  %v1384_v3 = vmul.f32 %v87_v34, %v87_v34 }
  0x58   :  { %2357 = vmatpush3.xpose.msra.mxu1 %v3015_v7  ;;  %2364 = vmatprep.mubr.msk.f32.mxu1 %vm2448_vm1, %v2447_v0 }
  0x59   :  { %2344 = vmatpush3.xpose.msra.mxu0 %v3021_v22  ;;  %2358 = vmatprep.subr.mxu1 %v2447_v0 }
  0x5a   :  { %1463 = vadd.xlane.f32.xlu1 %v1351_v24  ;;  %2345 = vmatprep.subr.mxu0 %v2447_v0  ;;  %v93_v24 = vld [vmem:[%s3673_s1 + $0x210] sm:$0xff] }
  0x5b   :  { %1461 = vadd.xlane.f32.xlu0 %v1350_v23  ;;  %v92_v23 = vld [vmem:[%s3673_s1 + $0x208] sm:$0xff]  ;;  %v1390_v29 = vmul.f32 %v93_v24, %v93_v24 }
  0x5c   :  { %2359 = vmatpush3.xpose.msra.mxu1 %v3039_v2 }
  0x5d   :  { %2346 = vmatpush3.xpose.msra.mxu0 %v3045_v19  ;;  %2360 = vmatprep.subr.mxu1 %v2447_v0 }
  0x5e   :  { %1468 = vadd.xlane.f32.xlu1 %v1467_v31  ;;  %2347 = vmatprep.subr.mxu0 %v2447_v0  ;;  %v1389_v31 = vmul.f32 %v92_v23, %v92_v23 }
  0x5f   :  { %1465 = vadd.xlane.f32.xlu0 %v1352_v11  ;;  %v98_v11 = vld [vmem:[%s3673_s1 + $0x238] sm:$0xff] }
  0x60   :  { %2361 = vmatpush3.xpose.msra.mxu1 %v3056_v44  ;;  %v3203_v44 = vld [vmem:[%s3673_s1 + $0x230] sm:$0xff] }
  0x61   :  { %2348 = vmatpush3.xpose.msra.mxu0 %v68_v57  ;;  %2362 = vmatprep.subr.mxu1 %v2447_v0  ;;  %v1395_v57 = vmul.f32 %v98_v11, %v98_v11 }
  0x62   :  { %1472 = vadd.xlane.f32.xlu1 %v1355_v60  ;;  %2349 = vmatprep.subr.mxu0 %v2447_v0  ;;  %v1394_v60 = vmul.f32 %v3203_v44, %v3203_v44 }
  0x63   :  { %1470 = vadd.xlane.f32.xlu0 %v1354_v21  ;;  %v103_v21 = vld [vmem:[%s3673_s1 + $0x260] sm:$0xff] }
  0x64   :  { %2363 = vmatpush3.xpose.msra.mxu1 %v72_v46  ;;  %v102_v46 = vld [vmem:[%s3673_s1 + $0x258] sm:$0xff] }
  0x65   :  { %2350 = vmatpush3.xpose.msra.mxu0 %v67_v4  ;;  %2380 = vmatprep.subr.mxu1 %v2447_v0  ;;  %v1400_v4 = vmul.f32 %v103_v21, %v103_v21 }
  0x66   :  { %1476 = vadd.xlane.f32.xlu1 %v1357_v9  ;;  %2367 = vmatprep.subr.mxu0 %v2447_v0 }
  0x67   :  { %2365 = vmatmul.mubr.f32.vlgmr.msra.gmra.mxu1 %v2581_v30  ;;  %1474 = vadd.xlane.f32.xlu0 %v1356_v16  ;;  %v3096_v30 = vld [vmem:[%s3673_s1 + $0x1a8] sm:$0xff]  ;;  %v1399_v16 = vmul.f32 %v102_v46, %v102_v46 }
  0x68   :  { %2352 = vmatmul.mubr.f32.vlgmr.msra.gmra.mxu0 %v2592_v32  ;;  %2381 = vmatpush3.xpose.msra.mxu1 %v2839_v42  ;;  %v1361_v32 = vmul.f32 %v2959_v47, %v2959_v47  ;;  %v1363_v42 = vmul.f32 %v2886_v61, %v2886_v61  ;;  %v3120_v61 = vld [vmem:[%s3673_s1 + $0x1a0] sm:$0xff] }
  0x69   :  { %2368 = vmatpush3.xpose.msra.mxu0 %v2834_v41  ;;  %2382 = vmatprep.subr.mxu1 %v2447_v0  ;;  %v1360_v41 = vmul.f32 %v2976_v33, %v2976_v33  ;;  %v83_v47 = vld [vmem:[%s3673_s1 + $0x1c0] sm:$0xff]  ;;  %v77_v33 = vld [vmem:[%s3673_s1 + $0x190] sm:$0xff] }
  0x6a   :  { %1481 = vadd.xlane.f32.xlu1 %v1359_v18  ;;  %2369 = vmatprep.subr.mxu0 %v2447_v0  ;;  %v1489_v8 = vsel %vm1259_vm0, %v1363_v42, 0.0  ;;  %v1374_v37 = vmul.f32 %v77_v33, %v77_v33  ;;  %v3229_v18 = vld [vmem:[%s3673_s1 + $0x270] sm:$0xff]  ;;  %v1376_v42 = vmul.f32 %v3120_v61, %v3120_v61 }
  0x6b   :  { %1479 = vadd.xlane.f32.xlu0 %v1478_v1  ;;  %2377 = vmatprep.mubr.msk.f32.mxu0 %vm2448_vm1, %v2447_v0 }
  0x6c   :  { %2383 = vmatpush3.xpose.msra.mxu1 %v3090_v5  ;;  %2390 = vmatprep.mubr.msk.f32.mxu1 %vm2448_vm1, %v2447_v0 }
  0x6d   :  { %2370 = vmatpush3.xpose.msra.mxu0 %v3096_v30  ;;  %2384 = vmatprep.subr.mxu1 %v2447_v0 }
  0x6e   :  { %1485 = vadd.xlane.f32.xlu1 %v1361_v32  ;;  %2371 = vmatprep.subr.mxu0 %v2447_v0  ;;  %v1381_v32 = vmul.f32 %v3114_v20, %v3114_v20 }
  0x6f   :  { %1483 = vadd.xlane.f32.xlu0 %v1360_v41 }
  0x70   :  { %2385 = vmatpush3.xpose.msra.mxu1 %v3114_v20 }
  0x71   :  { %2372 = vmatpush3.xpose.msra.mxu0 %v3120_v61  ;;  %2386 = vmatprep.subr.mxu1 %v2447_v0 }
  0x72   :  { %1490 = vadd.xlane.f32.xlu1 %v1489_v8  ;;  %2373 = vmatprep.subr.mxu0 %v2447_v0 }
  0x73   :  { %1487 = vadd.xlane.f32.xlu0 %v1362_v25  ;;  %v1391_v25 = vmul.f32 %v3179_v50, %v3179_v50 }
  0x74   :  { %2387 = vmatpush3.xpose.msra.mxu1 %v83_v47 }
  0x75   :  { %2374 = vmatpush3.xpose.msra.mxu0 %v78_v62  ;;  %2388 = vmatprep.subr.mxu1 %v2447_v0 }
  0x76   :  { %1494 = vadd.xlane.f32.xlu1 %v1365_v6  ;;  %2375 = vmatprep.subr.mxu0 %v2447_v0 }
  0x77   :  { %1492 = vadd.xlane.f32.xlu0 %v1364_v15 }
  0x78   :  { %2389 = vmatpush3.xpose.msra.mxu1 %v82_v28 }
  0x79   :  { %2376 = vmatpush3.xpose.msra.mxu0 %v77_v33  ;;  %2406 = vmatprep.subr.mxu1 %v2447_v0  ;;  %v1372_v33 = vmul.f32 %v3015_v7, %v3015_v7 }
  0x7a   :  { %1505 = vadd.xlane.f32.xlu1 %v1370_v35  ;;  %2393 = vmatprep.subr.mxu0 %v2447_v0 }
  0x7b   :  { %2391 = vmatmul.mubr.f32.vlgmr.msra.gmra.mxu1 %v2609_v38  ;;  %1503 = vadd.xlane.f32.xlu0 %v1369_v55  ;;  %v3161_v38 = vld [vmem:[%s3673_s1 + $0x1f8] sm:$0xff] }
  0x7c   :  { %2378 = vmatmul.mubr.f32.vlgmr.msra.gmra.mxu0 %v2620_v40  ;;  %2407 = vmatpush3.xpose.msra.mxu1 %v2880_v54  ;;  %v1380_v40 = vmul.f32 %v83_v47, %v83_v47  ;;  %v1379_v54 = vmul.f32 %v82_v28, %v82_v28  ;;  %v1386_v47 = vmul.f32 %v3185_v51, %v3185_v51 }
  0x7d   :  { %2394 = vmatpush3.xpose.msra.mxu0 %v2875_v63  ;;  %2408 = vmatprep.subr.mxu1 %v2447_v0  ;;  %v88_v63 = vld [vmem:[%s3673_s1 + $0x1e8] sm:$0xff] }
  0x7e   :  { %1516 = vadd.xlane.f32.xlu1 %v1375_v36  ;;  %2395 = vmatprep.subr.mxu0 %v2447_v0  ;;  %v1385_v52 = vmul.f32 %v88_v63, %v88_v63  ;;  %v1382_v36 = vmul.f32 %v3090_v5, %v3090_v5  ;;  %v1402_v5 = vmul.f32 %v3229_v18, %v3229_v18 }
  0x7f   :  { %1514 = vadd.xlane.f32.xlu0 %v1374_v37  ;;  %2403 = vmatprep.mubr.msk.f32.mxu0 %vm2448_vm1, %v2447_v0 }
  0x80   :  { %2409 = vmatpush3.xpose.msra.mxu1 %v3155_v49  ;;  %2416 = vmatprep.mubr.msk.f32.mxu1 %vm2448_vm1, %v2447_v0 }
  0x81   :  { %2396 = vmatpush3.xpose.msra.mxu0 %v3161_v38  ;;  %2410 = vmatprep.subr.mxu1 %v2447_v0 }
  0x82   :  { %1527 = vadd.xlane.f32.xlu1 %v1380_v40  ;;  %2397 = vmatprep.subr.mxu0 %v2447_v0  ;;  %v1387_v40 = vmul.f32 %v3161_v38, %v3161_v38 }
  0x83   :  { %1525 = vadd.xlane.f32.xlu0 %v1379_v54 }
  0x84   :  { %2411 = vmatpush3.xpose.msra.mxu1 %v3179_v50 }
  0x85   :  { %2398 = vmatpush3.xpose.msra.mxu0 %v3185_v51  ;;  %2412 = vmatprep.subr.mxu1 %v2447_v0 }
  0x86   :  { %1538 = vadd.xlane.f32.xlu1 %v1385_v52  ;;  %2399 = vmatprep.subr.mxu0 %v2447_v0 }
  0x87   :  { %1536 = vadd.xlane.f32.xlu0 %v1384_v3 }
  0x88   :  { %2413 = vmatpush3.xpose.msra.mxu1 %v93_v24  ;;  %v1660_v24 = vlaneseq }
  0x89   :  { %2400 = vmatpush3.xpose.msra.mxu0 %v88_v63  ;;  %2414 = vmatprep.subr.mxu1 %v2447_v0 }
  0x8a   :  { %1549 = vadd.xlane.f32.xlu1 %v1390_v29  ;;  %2401 = vmatprep.subr.mxu0 %v2447_v0 }
  0x8b   :  { %1547 = vadd.xlane.f32.xlu0 %v1389_v31  ;;  %v1661_v31 = vand.u32 127, %v1660_v24 }
  0x8c   :  { %2415 = vmatpush3.xpose.msra.mxu1 %v92_v23 }
  0x8d   :  { %2402 = vmatpush3.xpose.msra.mxu0 %v87_v34  ;;  %2432 = vmatprep.subr.mxu1 %v2447_v0 }
  0x8e   :  { %1560 = vadd.xlane.f32.xlu1 %v1395_v57  ;;  %2419 = vmatprep.subr.mxu0 %v2447_v0 }
  0x8f   :  { %2417 = vmatmul.mubr.f32.vlgmr.msra.gmra.mxu1 %v2633_v45  ;;  %1558 = vadd.xlane.f32.xlu0 %v1394_v60  ;;  %v3218_v9 = vpop.xlane.xlu1 %1267  ;;  %v3222_v13 = vpop.xlane.xlu0 %1261  ;;  %v3235_v45 = vld [vmem:[%s3673_s1 + $0x248] sm:$0xff]  ;;  %v1680_v60 = vadd.s32 4294967272, %v1661_v31 }
  0x90   :  { %2404 = vmatmul.mubr.f32.vlgmr.msra.gmra.mxu0 %v2649_v48  ;;  %2433 = vmatpush3.xpose.msra.mxu1 %v2913_v17  ;;  %v1371_v48 = vmul.f32 %v3039_v2, %v3039_v2  ;;  %v104_v2 = vld [vmem:[%s3673_s1 + $0x268] sm:$0xff]  ;;  %v1397_v63 = vmul.f32 %v3235_v45, %v3235_v45 }
  0x91   :  { %2420 = vmatpush3.xpose.msra.mxu0 %v2918_v14  ;;  %2434 = vmatprep.subr.mxu1 %v2447_v0  ;;  %v1366_v14 = vmul.f32 %v3045_v19, %v3045_v19  ;;  %v99_v19 = vld [vmem:[%s3673_s1 + $0x240] sm:$0xff]  ;;  %v1401_v62 = vmul.f32 %v104_v2, %v104_v2 }
  0x92   :  { %1571 = vadd.xlane.f32.xlu1 %v1400_v4  ;;  %2421 = vmatprep.subr.mxu0 %v2447_v0  ;;  %v1396_v15 = vmul.f32 %v99_v19, %v99_v19 }
  0x93   :  { %1569 = vadd.xlane.f32.xlu0 %v1399_v16  ;;  %v3239_v17 = vpop.xlane.xlu1 %1270  ;;  %2429 = vmatprep.mubr.msk.f32.mxu0 %vm2448_vm1, %v2447_v0  ;;  %v3246_v1 = vpop.xlane.xlu0 %1264 }
  0x94   :  { %2435 = vmatpush3.xpose.msra.mxu1 %v3229_v18  ;;  %2442 = vmatprep.mubr.msk.f32.mxu1 %vm2448_vm1, %v2447_v0  ;;  %v1687_v18 = vadd.s32 4294967264, %v1661_v31 }
  0x95   :  { %2422 = vmatpush3.xpose.msra.mxu0 %v3235_v45  ;;  %2436 = vmatprep.subr.mxu1 %v2447_v0 }
  0x96   :  { %1507 = vadd.xlane.f32.xlu1 %v1371_v48  ;;  %2423 = vmatprep.subr.mxu0 %v2447_v0 }
  0x97   :  { %1496 = vadd.xlane.f32.xlu0 %v1366_v14  ;;  %v3261_v41 = vpop.xlane.xlu1 %1276  ;;  %v3265_v8 = vpop.xlane.xlu0 %1273 }
  0x98   :  { %2437 = vmatpush3.xpose.msra.mxu1 %v104_v2 }
  0x99   :  { %2424 = vmatpush3.xpose.msra.mxu0 %v99_v19  ;;  %2438 = vmatprep.subr.mxu1 %v2447_v0 }
  0x9a   :  { %1529 = vadd.xlane.f32.xlu1 %v1381_v32  ;;  %2425 = vmatprep.subr.mxu0 %v2447_v0 }
  0x9b   :  { %1518 = vadd.xlane.f32.xlu0 %v1376_v42  ;;  %v3271_v20 = vpop.xlane.xlu1 %1282  ;;  %v3275_v61 = vpop.xlane.xlu0 %1279 }
  0x9c   :  { %2439 = vmatpush3.xpose.msra.mxu1 %v103_v21 }
  0x9d   :  { %2426 = vmatpush3.xpose.msra.mxu0 %v98_v11  ;;  %2440 = vmatprep.subr.mxu1 %v2447_v0 }
  0x9e   :  { %1551 = vadd.xlane.f32.xlu1 %v1391_v25  ;;  %2427 = vmatprep.subr.mxu0 %v2447_v0  ;;  %v1367_v0 = vmul.f32 %v3021_v22, %v3021_v22  ;;  %v1392_v22 = vmul.f32 %v3155_v49, %v3155_v49 }
  0x9f   :  { %1540 = vadd.xlane.f32.xlu0 %v1386_v47  ;;  %v3279_v6 = vpop.xlane.xlu1 %1288 }
  0xa0   :  { %2441 = vmatpush3.xpose.msra.mxu1 %v102_v46  ;;  %v3281_v28 = vpop.xlane.xlu0 %1285 }
  0xa1   :  { %2428 = vmatpush3.xpose.msra.mxu0 %v3203_v44  ;;  %v1673_v44 = vadd.s32 4294967280, %v1661_v31 }
  0xa2   :  { %1573 = vadd.xlane.f32.xlu1 %v1401_v62 }
  0xa3   :  { %2443 = vmatmul.mubr.f32.vlgmr.msra.gmra.mxu1 %v2664_v53  ;;  %1562 = vadd.xlane.f32.xlu0 %v1396_v15  ;;  %v3287_v35 = vpop.xlane.xlu1 %1294  ;;  %v1377_v53 = vmul.f32 %v3096_v30, %v3096_v30 }
  0xa4   :  { %2430 = vmatmul.mubr.f32.vlgmr.msra.gmra.mxu0 %v2681_v56  ;;  %v3292_v55 = vpop.xlane.xlu0 %1291 }
  0xa6   :  { %1509 = vadd.xlane.f32.xlu1 %v1372_v33 }
  0xa7   :  { %1498 = vadd.xlane.f32.xlu0 %v1367_v0  ;;  %v3296_v37 = vpop.xlane.xlu1 %1300 }
  0xa8   :  { %v3300_v7 = vpop.xlane.xlu0 %1297 }
  0xaa   :  { %1531 = vadd.xlane.f32.xlu1 %v1382_v36 }
  0xab   :  { %1520 = vadd.xlane.f32.xlu0 %v1377_v53  ;;  %v3304_v56 = vpop.xlane.xlu1 %1306 }
  0xac   :  { %v3308_v54 = vpop.xlane.xlu0 %1303 }
  0xae   :  { %1553 = vadd.xlane.f32.xlu1 %v1392_v22 }
  0xaf   :  { %1542 = vadd.xlane.f32.xlu0 %v1387_v40  ;;  %v1407_v30 = vpop.xlane.xlu1 %1406 }
  0xb0   :  { %v1405_v34 = vpop.xlane.xlu0 %1404 }
  0xb2   :  { %1575 = vadd.xlane.f32.xlu1 %v1402_v5 }
  0xb3   :  { %1564 = vadd.xlane.f32.xlu0 %v1397_v63  ;;  %v1411_v49 = vpop.xlane.xlu1 %1410 }
  0xb4   :  { %v1409_v50 = vpop.xlane.xlu0 %1408 }
  0xb6   :  { %1512 = vadd.xlane.f32.xlu1 %v2828_v39 }
  0xb7   :  { %1501 = vadd.xlane.f32.xlu0 %v2842_v43  ;;  %v1416_v38 = vpop.xlane.xlu1 %1415 }
  0xb8   :  { %v3316_v51 = vpop.xlane.xlu0 %1413 }
  0xba   :  { %1534 = vadd.xlane.f32.xlu1 %v2864_v58  ;;  %v1663_v58 = vshrl.u32 %v1660_v24, 7 }
  0xbb   :  { %1523 = vadd.xlane.f32.xlu0 %v2867_v59  ;;  %v1420_v52 = vpop.xlane.xlu1 %1419  ;;  %v1666_v59 = vadd.s32 4294967288, %v1661_v31 }
  0xbc   :  { %v1418_v3 = vpop.xlane.xlu0 %1417  ;;  %v3344_v48 = vsub.s32 %v1680_v60, %v1663_v58  ;;  %v3349_v25 = vsub.s32 %v1687_v18, %v1663_v58 }
  0xbe   :  { %1556 = vadd.xlane.f32.xlu1 %v2902_v10  ;;  %v3332_v10 = vsub.s32 %v1666_v59, %v1663_v58  ;;  %v1684_v62 = vrot.slane %v1411_v49, %v3344_v48  ;;  %v1691_v22 = vrot.slane %v3316_v51, %v3349_v25 }
  0xbf   :  { %1545 = vadd.xlane.f32.xlu0 %v2905_v12  ;;  %v1425_v23 = vpop.xlane.xlu1 %1424  ;;  %v3334_v12 = vsub.s32 %v1661_v31, %v1663_v58 }
  0xc0   :  { %v1422_v29 = vpop.xlane.xlu0 %1421  ;;  %v1670_v46 = vrot.slane %v1407_v30, %v3332_v10  ;;  %v1701_v45 = vrot.slane %v1418_v3, %v3332_v10  ;;  %v1716_v30 = vrot.slane %v1425_v23, %v3349_v25 }
  0xc1   :  { %v1665_v4 = vrot.slane %v1405_v34, %v3334_v12  ;;  %v1697_v16 = vrot.slane %v1416_v38, %v3334_v12  ;;  %v1711_v0 = vrot.slane %v1422_v29, %v3344_v48 }
  0xc2   :  { %1578 = vadd.xlane.f32.xlu1 %v2946_v26  ;;  %v3336_v26 = vsub.s32 %v1673_v44, %v1663_v58 }
  0xc3   :  { %1567 = vadd.xlane.f32.xlu0 %v2949_v27  ;;  %v3324_v39 = vpop.xlane.xlu1 %1428  ;;  %v1672_v32 = vsel %vm1671_vm2, %v1670_v46, %v1665_v4  ;;  %v1702_v47 = vsel %vm1671_vm2, %v1701_v45, %v1697_v16 }
  0xc4   :  { %v3326_v43 = vpop.xlane.xlu0 %1426  ;;  %v1677_v2 = vrot.slane %v1409_v50, %v3336_v26  ;;  %v1706_v42 = vrot.slane %v1420_v52, %v3336_v26  ;;  %v1725_v16 = vrot.slane %v3324_v39, %v3332_v10 }
  0xc5   :  { %v1721_v18 = vrot.slane %v3326_v43, %v3334_v12 }
  0xc6   :  { %v1679_v33 = vsel %vm1678_vm3, %v1677_v2, %v1672_v32  ;;  %v1707_v53 = vsel %vm1678_vm3, %v1706_v42, %v1702_v47 }
  0xc7   :  { %v3328_v11 = vpop.xlane.xlu1 %1432  ;;  %v1686_v5 = vsel %vm1685_vm4, %v1684_v62, %v1679_v33  ;;  %v1712_v50 = vsel %vm1685_vm4, %v1711_v0, %v1707_v53  ;;  %v1726_v62 = vsel %vm1671_vm2, %v1725_v16, %v1721_v18 }
  0xc8   :  { %v3330_v57 = vpop.xlane.xlu0 %1430  ;;  %v1693_v51 = vsel %vm1692_vm5, %v1691_v22, %v1686_v5  ;;  %v1717_v23 = vsel %vm1692_vm5, %v1716_v30, %v1712_v50  ;;  %v1735_v39 = vrot.slane %v3328_v11, %v3344_v48 }
  0xc9   :  { %v1730_v42 = vrot.slane %v3330_v57, %v3336_v26 }
  0xcb   :  { %v1438_v21 = vpop.xlane.xlu1 %1437  ;;  %v1731_v0 = vsel %vm1678_vm3, %v1730_v42, %v1726_v62 }
  0xcc   :  { %v3338_v27 = vpop.xlane.xlu0 %1435  ;;  %v1736_v11 = vsel %vm1685_vm4, %v1735_v39, %v1731_v0 }
  0xcd   :  { %v1740_v22 = vrot.slane %v3338_v27, %v3349_v25 }
  0xcf   :  { %v1442_v14 = vpop.xlane.xlu1 %1441  ;;  %v1741_v27 = vsel %vm1692_vm5, %v1740_v22, %v1736_v11 }
  0xd0   :  { %v1440_v19 = vpop.xlane.xlu0 %1439  ;;  %v1754_v32 = vrot.slane %v1442_v14, %v3336_v26 }
  0xd1   :  { %v1749_v4 = vrot.slane %v1440_v19, %v3332_v10 }
  0xd3   :  { %v3353_v15 = vpop.xlane.xlu1 %1446 }
  0xd4   :  { %v1444_v36 = vpop.xlane.xlu0 %1443  ;;  %v1764_v14 = vrot.slane %v3353_v15, %v3349_v25 }
  0xd5   :  { %v1759_v19 = vrot.slane %v1444_v36, %v3344_v48 }
  0xd6   :  { %v173_v40 = vpop.f32.mrf.mxu0 }
  0xd7   :  { %v1227_v63 = vmul.f32 -2.0, %v173_v40  ;;  %v243_v34 = vpop.f32.mrf.mxu1  ;;  %v3362_v49 = vpop.xlane.xlu1 %1450 }
  0xd8   :  { %v1228_v38 = vmul.f32 -2.0, %v243_v34  ;;  %v3365_v52 = vpop.xlane.xlu0 %1448  ;;  %v2249_v3 = vpop.f32.mrf.mxu0 }
  0xd9   :  { %v1308_v24 = vadd.f32 %v3222_v13, %v1227_v63  ;;  %v2262_v29 = vpop.f32.mrf.mxu1 }
  0xda   :  { %v1309_v31 = vadd.f32 %v3246_v1, %v1228_v38  ;;  %v1745_v1 = vrot.slane %v1438_v21, %v3334_v12 }
  0xdb   :  { %v2104_v58 = vadd.f32 %v1693_v51, %v1308_v24  ;;  %v3371_v59 = vpop.xlane.xlu1 %1454 }
  0xdc   :  { %v2105_v44 = vadd.f32 %v1717_v23, %v1309_v31  ;;  %v1453_v60 = vpop.xlane.xlu0 %1452  ;;  %v1750_v47 = vsel %vm1671_vm2, %v1749_v4, %v1745_v1  ;;  %v1769_v1 = vrot.slane %v3365_v52, %v3334_v12 }
  0xdd   :  { %2121 = vst.msk [vmem:[%s3675_s2] sm:$0xf] %vm2120_vm6, %v2104_v58  ;;  %v1755_v43 = vsel %vm1678_vm3, %v1754_v32, %v1750_v47  ;;  %v1778_v32 = vrot.slane %v1453_v60, %v3336_v26 }
  0xde   :  { %2122 = vst.msk [vmem:[%s3675_s2 + $0x4] sm:$0xf] %vm2120_vm6, %v2105_v44  ;;  %v1760_v40 = vsel %vm1685_vm4, %v1759_v19, %v1755_v43  ;;  %v1773_v44 = vrot.slane %v3362_v49, %v3332_v10  ;;  %v1783_v49 = vrot.slane %v3371_v59, %v3344_v48 }
  0xdf   :  { %v1460_v13 = vpop.xlane.xlu1 %1459  ;;  %v1765_v3 = vsel %vm1692_vm5, %v1764_v14, %v1760_v40 }
  0xe0   :  { %v3381_v46 = vpop.xlane.xlu0 %1457  ;;  %v1793_v58 = vrot.slane %v1460_v13, %v3334_v12  ;;  %v1774_v47 = vsel %vm1671_vm2, %v1773_v44, %v1769_v1 }
  0xe1   :  { %v1779_v52 = vsel %vm1678_vm3, %v1778_v32, %v1774_v47  ;;  %v1788_v60 = vrot.slane %v3381_v46, %v3349_v25 }
  0xe2   :  { %v1784_v59 = vsel %vm1685_vm4, %v1783_v49, %v1779_v52 }
  0xe3   :  { %v1464_v45 = vpop.xlane.xlu1 %1463  ;;  %v1789_v46 = vsel %vm1692_vm5, %v1788_v60, %v1784_v59 }
  0xe4   :  { %v1462_v2 = vpop.xlane.xlu0 %1461  ;;  %v1802_v18 = vrot.slane %v1464_v45, %v3336_v26 }
  0xe5   :  { %v1797_v23 = vrot.slane %v1462_v2, %v3332_v10 }
  0xe7   :  { %v1469_v21 = vpop.xlane.xlu1 %1468  ;;  %v1798_v42 = vsel %vm1671_vm2, %v1797_v23, %v1793_v58 }
  0xe8   :  { %v1466_v33 = vpop.xlane.xlu0 %1465  ;;  %v1803_v19 = vsel %vm1678_vm3, %v1802_v18, %v1798_v42  ;;  %v1812_v39 = vrot.slane %v1469_v21, %v3349_v25 }
  0xe9   :  { %v1807_v13 = vrot.slane %v1466_v33, %v3344_v48 }
  0xeb   :  { %v383_v53 = vpop.f32.mrf.mxu1  ;;  %v3401_v57 = vpop.xlane.xlu1 %1472  ;;  %v1808_v0 = vsel %vm1685_vm4, %v1807_v13, %v1803_v19 }
  0xec   :  { %v313_v36 = vpop.f32.mrf.mxu0  ;;  %v1230_v5 = vmul.f32 -2.0, %v383_v53  ;;  %v3406_v30 = vpop.xlane.xlu0 %1470  ;;  %v1813_v11 = vsel %vm1692_vm5, %v1812_v39, %v1808_v0 }
  0xed   :  { %v1229_v63 = vmul.f32 -2.0, %v313_v36  ;;  %v2288_v34 = vpop.f32.mrf.mxu1 }
  0xee   :  { %v1311_v50 = vadd.f32 %v3239_v17, %v1230_v5  ;;  %v2275_v38 = vpop.f32.mrf.mxu0 }
  0xef   :  { %v1310_v15 = vadd.f32 %v3218_v9, %v1229_v63  ;;  %v3412_v24 = vpop.xlane.xlu1 %1476 }
  0xf0   :  { %v2107_v29 = vadd.f32 %v1765_v3, %v1311_v50  ;;  %v3415_v51 = vpop.xlane.xlu0 %1474 }
  0xf1   :  { %v2106_v31 = vadd.f32 %v1741_v27, %v1310_v15  ;;  %v1821_v27 = vrot.slane %v3401_v57, %v3332_v10  ;;  %v1826_v44 = vrot.slane %v3415_v51, %v3336_v26 }
  0xf2   :  { %2124 = vst.msk [vmem:[%s3675_s2 + $0xc] sm:$0xf] %vm2120_vm6, %v2107_v29  ;;  %v1817_v29 = vrot.slane %v3406_v30, %v3334_v12  ;;  %v1831_v30 = vrot.slane %v3412_v24, %v3344_v48 }
  0xf3   :  { %2123 = vst.msk [vmem:[%s3675_s2 + $0x8] sm:$0xf] %vm2120_vm6, %v2106_v31  ;;  %v1482_v9 = vpop.xlane.xlu1 %1481 }
  0xf4   :  { %v3425_v17 = vpop.xlane.xlu0 %1479  ;;  %v1841_v15 = vrot.slane %v1482_v9, %v3334_v12  ;;  %v1822_v9 = vsel %vm1671_vm2, %v1821_v27, %v1817_v29 }
  0xf5   :  { %v1836_v13 = vrot.slane %v3425_v17, %v3349_v25 }
  0xf7   :  { %v1486_v4 = vpop.xlane.xlu1 %1485 }
  0xf8   :  { %v1484_v16 = vpop.xlane.xlu0 %1483  ;;  %v1850_v23 = vrot.slane %v1486_v4, %v3336_v26  ;;  %v1827_v4 = vsel %vm1678_vm3, %v1826_v44, %v1822_v9 }
  0xf9   :  { %v1845_v3 = vrot.slane %v1484_v16, %v3332_v10  ;;  %v1832_v24 = vsel %vm1685_vm4, %v1831_v30, %v1827_v4 }
  0xfa   :  { %v1837_v17 = vsel %vm1692_vm5, %v1836_v13, %v1832_v24 }
  0xfb   :  { %v1491_v62 = vpop.xlane.xlu1 %1490  ;;  %v1846_v1 = vsel %vm1671_vm2, %v1845_v3, %v1841_v15 }
  0xfc   :  { %v1488_v2 = vpop.xlane.xlu0 %1487  ;;  %v1851_v32 = vsel %vm1678_vm3, %v1850_v23, %v1846_v1  ;;  %v1860_v42 = vrot.slane %v1491_v62, %v3349_v25 }
  0xfd   :  { %v1855_v57 = vrot.slane %v1488_v2, %v3344_v48 }
  0xff   :  { %v523_v45 = vpop.f32.mrf.mxu1  ;;  %v3443_v43 = vpop.xlane.xlu1 %1494  ;;  %v1856_v49 = vsel %vm1685_vm4, %v1855_v57, %v1851_v32 }
 0x100   :  { %v453_v14 = vpop.f32.mrf.mxu0  ;;  %v1232_v33 = vmul.f32 -2.0, %v523_v45  ;;  %v3448_v53 = vpop.xlane.xlu0 %1492 }
 0x101   :  { %v1231_v22 = vmul.f32 -2.0, %v453_v14  ;;  %v2314_v40 = vpop.f32.mrf.mxu1  ;;  %v1861_v14 = vsel %vm1692_vm5, %v1860_v42, %v1856_v49  ;;  %v1865_v24 = vrot.slane %v3448_v53, %v3334_v12 }
 0x102   :  { %v1313_v36 = vadd.f32 %v3261_v41, %v1232_v33  ;;  %v2301_v5 = vpop.f32.mrf.mxu0 }
 0x103   :  { %v1312_v21 = vadd.f32 %v3265_v8, %v1231_v22  ;;  %v3454_v63 = vpop.xlane.xlu1 %1505 }
 0x104   :  { %v2109_v34 = vadd.f32 %v1813_v11, %v1313_v36  ;;  %v3457_v50 = vpop.xlane.xlu0 %1503 }
 0x105   :  { %v2108_v38 = vadd.f32 %v1789_v46, %v1312_v21 }
 0x106   :  { %2126 = vst.msk [vmem:[%s3675_s2 + $0x14] sm:$0xf] %vm2120_vm6, %v2109_v34 }
 0x107   :  { %2125 = vst.msk [vmem:[%s3675_s2 + $0x10] sm:$0xf] %vm2120_vm6, %v2108_v38  ;;  %v3467_v41 = vpop.xlane.xlu1 %1516 }
 0x108   :  { %v3469_v8 = vpop.xlane.xlu0 %1514 }
 0x10b   :  { %v3477_v31 = vpop.xlane.xlu1 %1527 }
 0x10c   :  { %v3479_v58 = vpop.xlane.xlu0 %1525 }
 0x10f   :  { %v3486_v16 = vpop.xlane.xlu1 %1538 }
 0x110   :  { %v3489_v18 = vpop.xlane.xlu0 %1536 }
 0x113   :  { %v663_v51 = vpop.f32.mrf.mxu1  ;;  %v3496_v47 = vpop.xlane.xlu1 %1549 }
 0x114   :  { %v593_v2 = vpop.f32.mrf.mxu0  ;;  %v1234_v19 = vmul.f32 -2.0, %v663_v51  ;;  %v3501_v52 = vpop.xlane.xlu0 %1547 }
 0x115   :  { %v1233_v39 = vmul.f32 -2.0, %v593_v2  ;;  %v2340_v45 = vpop.f32.mrf.mxu1 }
 0x116   :  { %v1315_v60 = vadd.f32 %v3271_v20, %v1234_v19  ;;  %v2327_v0 = vpop.f32.mrf.mxu0  ;;  %v1869_v19 = vrot.slane %v3443_v43, %v3332_v10  ;;  %v1889_v45 = vrot.slane %v3457_v50, %v3334_v12 }
 0x117   :  { %v1314_v62 = vadd.f32 %v3275_v61, %v1233_v39  ;;  %v1561_v33 = vpop.xlane.xlu1 %1560  ;;  %v1893_v39 = vrot.slane %v3454_v63, %v3332_v10  ;;  %v1937_v0 = vrot.slane %v3479_v58, %v3334_v12  ;;  %v1917_v58 = vrot.slane %v3467_v41, %v3332_v10 }
 0x118   :  { %v2111_v59 = vadd.f32 %v1861_v14, %v1315_v60  ;;  %v2013_v22 = vrot.slane %v1561_v33, %v3332_v10  ;;  %v1559_v40 = vpop.xlane.xlu0 %1558  ;;  %v1941_v60 = vrot.slane %v3477_v31, %v3332_v10  ;;  %v1870_v50 = vsel %vm1671_vm2, %v1869_v19, %v1865_v24 }
 0x119   :  { %v2110_v36 = vadd.f32 %v1837_v17, %v1314_v62  ;;  %v2009_v5 = vrot.slane %v1559_v40, %v3334_v12  ;;  %v1894_v40 = vsel %vm1671_vm2, %v1893_v39, %v1889_v45 }
 0x11a   :  { %2128 = vst.msk [vmem:[%s3675_s2 + $0x1c] sm:$0xf] %vm2120_vm6, %v2111_v59 }
 0x11b   :  { %2127 = vst.msk [vmem:[%s3675_s2 + $0x18] sm:$0xf] %vm2120_vm6, %v2110_v36  ;;  %v3519_v20 = vsel %vm1671_vm2, %v2013_v22, %v2009_v5  ;;  %v1572_v61 = vpop.xlane.xlu1 %1571  ;;  %v1913_v36 = vrot.slane %v3469_v8, %v3334_v12 }
 0x11c   :  { %v2037_v21 = vrot.slane %v1572_v61, %v3332_v10  ;;  %v1570_v11 = vpop.xlane.xlu0 %1569 }
 0x11d   :  { %v2033_v46 = vrot.slane %v1570_v11, %v3334_v12 }
 0x11f   :  { %v3524_v34 = vsel %vm1671_vm2, %v2037_v21, %v2033_v46  ;;  %v1508_v38 = vpop.xlane.xlu1 %1507  ;;  %v1942_v21 = vsel %vm1671_vm2, %v1941_v60, %v1937_v0  ;;  %v1918_v60 = vsel %vm1671_vm2, %v1917_v58, %v1913_v36  ;;  %v1989_v58 = vrot.slane %v3496_v47, %v3332_v10 }
 0x120   :  { %v1497_v15 = vpop.xlane.xlu0 %1496  ;;  %v1898_v62 = vrot.slane %v1508_v38, %v3336_v26  ;;  %v1965_v36 = vrot.slane %v3486_v16, %v3332_v10 }
 0x121   :  { %v1874_v14 = vrot.slane %v1497_v15, %v3336_v26 }
 0x122   :  { %v1899_v11 = vsel %vm1678_vm3, %v1898_v62, %v1894_v40 }
 0x123   :  { %v1530_v3 = vpop.xlane.xlu1 %1529  ;;  %v1875_v46 = vsel %vm1678_vm3, %v1874_v14, %v1870_v50 }
 0x124   :  { %v3526_v27 = vpop.xlane.xlu0 %1518  ;;  %v1946_v38 = vrot.slane %v1530_v3, %v3336_v26 }
 0x126   :  { %v1947_v0 = vsel %vm1678_vm3, %v1946_v38, %v1942_v21 }
 0x127   :  { %v803_v29 = vpop.f32.mrf.mxu1  ;;  %v3528_v23 = vpop.xlane.xlu1 %1551 }
 0x128   :  { %v733_v44 = vpop.f32.mrf.mxu0  ;;  %v3530_v1 = vpop.xlane.xlu0 %1540  ;;  %v1236_v17 = vmul.f32 -2.0, %v803_v29  ;;  %v1922_v29 = vrot.slane %v3526_v27, %v3336_v26  ;;  %v1994_v21 = vrot.slane %v3528_v23, %v3336_v26 }
 0x129   :  { %v2366_v9 = vpop.f32.mrf.mxu1  ;;  %v1235_v53 = vmul.f32 -2.0, %v733_v44 }
 0x12a   :  { %v2353_v57 = vpop.f32.mrf.mxu0  ;;  %v1317_v44 = vadd.f32 %v3279_v6, %v1236_v17 }
 0x12b   :  { %v3532_v30 = vpop.xlane.xlu1 %1573  ;;  %v1316_v41 = vadd.f32 %v3281_v28, %v1235_v53 }
 0x12c   :  { %v3534_v32 = vpop.xlane.xlu0 %1562 }
 0x12f   :  { %v1510_v4 = vpop.xlane.xlu1 %1509 }
 0x130   :  { %v1499_v42 = vpop.xlane.xlu0 %1498  ;;  %v1903_v22 = vrot.slane %v1510_v4, %v3344_v48 }
 0x131   :  { %v1879_v5 = vrot.slane %v1499_v42, %v3344_v48 }
 0x132   :  { %v1904_v57 = vsel %vm1685_vm4, %v1903_v22, %v1899_v11 }
 0x133   :  { %v1532_v51 = vpop.xlane.xlu1 %1531  ;;  %v1880_v3 = vsel %vm1685_vm4, %v1879_v5, %v1875_v46  ;;  %v1961_v5 = vrot.slane %v3489_v18, %v3334_v12 }
 0x134   :  { %v1521_v13 = vpop.xlane.xlu0 %1520  ;;  %v1951_v4 = vrot.slane %v1532_v51, %v3344_v48 }
 0x135   :  { %v1927_v24 = vrot.slane %v1521_v13, %v3344_v48  ;;  %v1966_v38 = vsel %vm1671_vm2, %v1965_v36, %v1961_v5 }
 0x136   :  { %v1952_v53 = vsel %vm1685_vm4, %v1951_v4, %v1947_v0 }
 0x137   :  { %v3536_v49 = vpop.xlane.xlu1 %1553 }
 0x138   :  { %v3538_v2 = vpop.xlane.xlu0 %1542  ;;  %v1999_v46 = vrot.slane %v3536_v49, %v3344_v48 }
 0x139   :  { %v1975_v10 = vrot.slane %v3538_v2, %v3344_v48 }
 0x13b   :  { %v943_v43 = vpop.f32.mrf.mxu1  ;;  %v3554_v33 = vpop.xlane.xlu1 %1575 }
 0x13c   :  { %v873_v59 = vpop.f32.mrf.mxu0  ;;  %v3556_v63 = vpop.xlane.xlu0 %1564  ;;  %v1238_v42 = vmul.f32 -2.0, %v943_v43  ;;  %v1923_v43 = vsel %vm1678_vm3, %v1922_v29, %v1918_v60 }
 0x13d   :  { %v2392_v31 = vpop.f32.mrf.mxu1  ;;  %v1237_v39 = vmul.f32 -2.0, %v873_v59  ;;  %v1928_v59 = vsel %vm1685_vm4, %v1927_v24, %v1923_v43  ;;  %v2042_v24 = vrot.slane %v3532_v30, %v3336_v26 }
 0x13e   :  { %v2379_v61 = vpop.f32.mrf.mxu0  ;;  %v1319_v13 = vadd.f32 %v3287_v35, %v1238_v42 }
 0x13f   :  { %v1513_v15 = vpop.xlane.xlu1 %1512  ;;  %v1318_v50 = vadd.f32 %v3292_v55, %v1237_v39  ;;  %v1985_v55 = vrot.slane %v3501_v52, %v3334_v12  ;;  %v1970_v52 = vrot.slane %v3530_v1, %v3336_v26  ;;  %v2043_v30 = vsel %vm1678_vm3, %v2042_v24, %v3524_v34 }
 0x140   :  { %v1908_v8 = vrot.slane %v1513_v15, %v3349_v25  ;;  %v1502_v9 = vpop.xlane.xlu0 %1501 }
 0x141   :  { %v1884_v19 = vrot.slane %v1502_v9, %v3349_v25  ;;  %v1990_v47 = vsel %vm1671_vm2, %v1989_v58, %v1985_v55  ;;  %v1971_v1 = vsel %vm1678_vm3, %v1970_v52, %v1966_v38 }
 0x142   :  { %v1909_v27 = vsel %vm1692_vm5, %v1908_v8, %v1904_v57  ;;  %v1995_v29 = vsel %vm1678_vm3, %v1994_v21, %v1990_v47  ;;  %v1976_v2 = vsel %vm1685_vm4, %v1975_v10, %v1971_v1 }
 0x143   :  { %v2113_v28 = vadd.f32 %v1909_v27, %v1317_v44  ;;  %v1885_v6 = vsel %vm1692_vm5, %v1884_v19, %v1880_v3  ;;  %v1535_v45 = vpop.xlane.xlu1 %1534  ;;  %v2000_v49 = vsel %vm1685_vm4, %v1999_v46, %v1995_v29  ;;  %v2047_v27 = vrot.slane %v3554_v33, %v3344_v48 }
 0x144   :  { %v2112_v62 = vadd.f32 %v1885_v6, %v1316_v41  ;;  %v1956_v51 = vrot.slane %v1535_v45, %v3349_v25  ;;  %v1524_v14 = vpop.xlane.xlu0 %1523 }
 0x145   :  { %2130 = vst.msk [vmem:[%s3675_s2 + $0x24] sm:$0xf] %vm2120_vm6, %v2113_v28  ;;  %v1932_v17 = vrot.slane %v1524_v14, %v3349_v25  ;;  %v2023_v28 = vrot.slane %v3556_v63, %v3344_v48 }
 0x146   :  { %2129 = vst.msk [vmem:[%s3675_s2 + $0x20] sm:$0xf] %vm2120_vm6, %v2112_v62  ;;  %v1957_v22 = vsel %vm1692_vm5, %v1956_v51, %v1952_v53 }
 0x147   :  { %v2115_v31 = vadd.f32 %v1957_v22, %v1319_v13  ;;  %v1933_v35 = vsel %vm1692_vm5, %v1932_v17, %v1928_v59  ;;  %v1557_v61 = vpop.xlane.xlu1 %1556 }
 0x148   :  { %v2114_v40 = vadd.f32 %v1933_v35, %v1318_v50  ;;  %v1546_v11 = vpop.xlane.xlu0 %1545  ;;  %v2004_v12 = vrot.slane %v1557_v61, %v3349_v25 }
 0x149   :  { %2132 = vst.msk [vmem:[%s3675_s2 + $0x2c] sm:$0xf] %vm2120_vm6, %v2115_v31  ;;  %v1980_v18 = vrot.slane %v1546_v11, %v3349_v25 }
 0x14a   :  { %2131 = vst.msk [vmem:[%s3675_s2 + $0x28] sm:$0xf] %vm2120_vm6, %v2114_v40  ;;  %v2005_v57 = vsel %vm1692_vm5, %v2004_v12, %v2000_v49 }
 0x14b   :  { %v1981_v42 = vsel %vm1692_vm5, %v1980_v18, %v1976_v2 }
 0x14c   :  { %v1568_v39 = vpop.xlane.xlu0 %1567 }
 0x14d   :  { %v2028_v60 = vrot.slane %v1568_v39, %v3349_v25 }
 0x14f   :  { %v1083_v16 = vpop.f32.mrf.mxu1 }
 0x150   :  { %v1013_v23 = vpop.f32.mrf.mxu0  ;;  %v1240_v15 = vmul.f32 -2.0, %v1083_v16 }
 0x151   :  { %v1239_v41 = vmul.f32 -2.0, %v1013_v23  ;;  %v2418_v44 = vpop.f32.mrf.mxu1 }
 0x152   :  { %v1321_v8 = vadd.f32 %v3296_v37, %v1240_v15  ;;  %v2405_v9 = vpop.f32.mrf.mxu0  ;;  %v1579_v37 = vpop.xlane.xlu1 %1578 }
 0x153   :  { %v1320_v4 = vadd.f32 %v3300_v7, %v1239_v41  ;;  %v2018_v7 = vrot.slane %v3534_v32, %v3336_v26  ;;  %v2052_v6 = vrot.slane %v1579_v37, %v3349_v25  ;;  %v2048_v32 = vsel %vm1685_vm4, %v2047_v27, %v2043_v30 }
 0x154   :  { %v2117_v19 = vadd.f32 %v2005_v57, %v1321_v8 }
 0x155   :  { %v2116_v3 = vadd.f32 %v1981_v42, %v1320_v4  ;;  %v2019_v26 = vsel %vm1678_vm3, %v2018_v7, %v3519_v20  ;;  %v2053_v43 = vsel %vm1692_vm5, %v2052_v6, %v2048_v32 }
 0x156   :  { %2134 = vst.msk [vmem:[%s3675_s2 + $0x34] sm:$0xf] %vm2120_vm6, %v2117_v19  ;;  %v2024_v63 = vsel %vm1685_vm4, %v2023_v28, %v2019_v26 }
 0x157   :  { %2133 = vst.msk [vmem:[%s3675_s2 + $0x30] sm:$0xf] %vm2120_vm6, %v2116_v3  ;;  %v2029_v53 = vsel %vm1692_vm5, %v2028_v60, %v2024_v63 }
 0x163   :  { %v1223_v45 = vpop.f32.mrf.mxu1 }
 0x164   :  { %v1153_v0 = vpop.f32.mrf.mxu0  ;;  %v1242_v62 = vmul.f32 -2.0, %v1223_v45 }
 0x165   :  { %v1241_v51 = vmul.f32 -2.0, %v1153_v0  ;;  %v2444_v14 = vpop.f32.mrf.mxu1 }
 0x166   :  { %v1323_v33 = vadd.f32 %v3304_v56, %v1242_v62  ;;  %v2431_v48 = vpop.f32.mrf.mxu0 }
 0x167   :  { %v1322_v25 = vadd.f32 %v3308_v54, %v1241_v51 }
 0x168   :  { %v2119_v13 = vadd.f32 %v2053_v43, %v1323_v33 }
 0x169   :  { %v2118_v34 = vadd.f32 %v2029_v53, %v1322_v25 }
 0x16a   :  { %2136 = vst.msk [vmem:[%s3675_s2 + $0x3c] sm:$0xf] %vm2120_vm6, %v2119_v13 }
 0x16b   :  { %2135 = vst.msk [vmem:[%s3675_s2 + $0x38] sm:$0xf] %vm2120_vm6, %v2118_v34 }

// kernel: selective_matching_crossview_forward.4
= control target key start
LH: loop header
LB: loop body
LE: loop exit
PB: predicated region body
PF: predicated region fallthrough
CT: control target
= control target key end

     0   :  { %v373_v3 = vmov 0.0   ;;  %vm44_vm0 = vcmask 261120   ;;  %s520_s1 = inlined_call_operand.vmem [shape: f32[32,1024], index: 1, kind: input, shape index: {}]   ;;  %s521_s0 = inlined_call_operand.vmem [shape: f32[8,32], index: 0, kind: input, shape index: {}]   ;;  %s522_s2 = inlined_call_operand.vmem [shape: f32[8,1024], index: 2, kind: output, shape index: {}]  }
   0x1   :  { %v37_v0 = vld [vmem:[%s520_s1 + $0xc8] sm:$0xff]  ;;  %v39_v1 = vld [vmem:[%s520_s1 + $0xd8] sm:$0xff]  ;;  %v36_v2 = vld [vmem:[%s520_s1 + $0xc0] sm:$0xff]  ;;  %112 = vmatprep.mubr.f32.mxu0 %v373_v3  ;;  %183 = vmatprep.mubr.f32.mxu1 %v373_v3 }
   0x2   :  { %72 = vmatprep.subr.mxu0 %v37_v0  ;;  %143 = vmatprep.subr.mxu1 %v39_v1  ;;  %v38_v4 = vld [vmem:[%s520_s1 + $0xd0] sm:$0xff]  ;;  %v29_v5 = vld [vmem:[%s520_s1 + $0x88] sm:$0xff]  ;;  %v31_v6 = vld [vmem:[%s520_s1 + $0x98] sm:$0xff] }
   0x3   :  { %73 = vmatpush1.msra.mxu0 %v36_v2  ;;  %144 = vmatpush1.msra.mxu1 %v38_v4  ;;  %v28_v7 = vld [vmem:[%s520_s1 + $0x80] sm:$0xff]  ;;  %v30_v8 = vld [vmem:[%s520_s1 + $0x90] sm:$0xff]  ;;  %v21_v9 = vld [vmem:[%s520_s1 + $0x48] sm:$0xff] }
   0x4   :  { %74 = vmatprep.subr.mxu0 %v29_v5  ;;  %145 = vmatprep.subr.mxu1 %v31_v6  ;;  %v23_v10 = vld [vmem:[%s520_s1 + $0x58] sm:$0xff]  ;;  %v20_v11 = vld [vmem:[%s520_s1 + $0x40] sm:$0xff]  ;;  %v22_v12 = vld [vmem:[%s520_s1 + $0x50] sm:$0xff] }
   0x5   :  { %75 = vmatpush1.msra.mxu0 %v28_v7  ;;  %146 = vmatpush1.msra.mxu1 %v30_v8  ;;  %v13_v13 = vld [vmem:[%s520_s1 + $0x8] sm:$0xff]  ;;  %v15_v14 = vld [vmem:[%s520_s1 + $0x18] sm:$0xff]  ;;  %v12_v15 = vld [vmem:[%s520_s1] sm:$0xff] }
   0x6   :  { %76 = vmatprep.subr.mxu0 %v21_v9  ;;  %147 = vmatprep.subr.mxu1 %v23_v10  ;;  %v14_v16 = vld [vmem:[%s520_s1 + $0x10] sm:$0xff]  ;;  %v11_v17 = vld [vmem:[%s521_s0] sm:$0xff]  ;;  %v41_v18 = vld [vmem:[%s520_s1 + $0xe8] sm:$0xff] }
   0x7   :  { %77 = vmatpush1.msra.mxu0 %v20_v11  ;;  %148 = vmatpush1.msra.mxu1 %v22_v12  ;;  %v43_v19 = vld [vmem:[%s520_s1 + $0xf8] sm:$0xff]  ;;  %v40_v20 = vld [vmem:[%s520_s1 + $0xe0] sm:$0xff]  ;;  %v42_v21 = vld [vmem:[%s520_s1 + $0xf0] sm:$0xff] }
   0x8   :  { %78 = vmatprep.subr.mxu0 %v13_v13  ;;  %149 = vmatprep.subr.mxu1 %v15_v14  ;;  %v33_v22 = vld [vmem:[%s520_s1 + $0xa8] sm:$0xff]  ;;  %v35_v23 = vld [vmem:[%s520_s1 + $0xb8] sm:$0xff]  ;;  %v32_v24 = vld [vmem:[%s520_s1 + $0xa0] sm:$0xff] }
   0x9   :  { %79 = vmatpush1.msra.mxu0 %v12_v15  ;;  %150 = vmatpush1.msra.mxu1 %v14_v16  ;;  %v34_v25 = vld [vmem:[%s520_s1 + $0xb0] sm:$0xff]  ;;  %v25_v26 = vld [vmem:[%s520_s1 + $0x68] sm:$0xff]  ;;  %v27_v27 = vld [vmem:[%s520_s1 + $0x78] sm:$0xff] }
   0xa   :  { %368 = vmatmul.mubr.msk.f32.vlgmr.msra.gmra.mxu0 %vm44_vm0, %v11_v17  ;;  %369 = vmatmul.mubr.msk.f32.vlgmr.msra.gmra.mxu1 %vm44_vm0, %v11_v17  ;;  %v24_v28 = vld [vmem:[%s520_s1 + $0x60] sm:$0xff]  ;;  %v26_v29 = vld [vmem:[%s520_s1 + $0x70] sm:$0xff]  ;;  %v17_v30 = vld [vmem:[%s520_s1 + $0x28] sm:$0xff] }
   0xb   :  { %214 = vmatprep.subr.mxu0 %v41_v18  ;;  %285 = vmatprep.subr.mxu1 %v43_v19  ;;  %v19_v31 = vld [vmem:[%s520_s1 + $0x38] sm:$0xff]  ;;  %v16_v32 = vld [vmem:[%s520_s1 + $0x20] sm:$0xff]  ;;  %v18_v33 = vld [vmem:[%s520_s1 + $0x30] sm:$0xff] }
   0xc   :  { %215 = vmatpush1.msra.mxu0 %v40_v20  ;;  %286 = vmatpush1.msra.mxu1 %v42_v21 }
   0xd   :  { %216 = vmatprep.subr.mxu0 %v33_v22  ;;  %287 = vmatprep.subr.mxu1 %v35_v23 }
   0xe   :  { %217 = vmatpush1.msra.mxu0 %v32_v24  ;;  %288 = vmatpush1.msra.mxu1 %v34_v25 }
   0xf   :  { %218 = vmatprep.subr.mxu0 %v25_v26  ;;  %289 = vmatprep.subr.mxu1 %v27_v27 }
  0x10   :  { %219 = vmatpush1.msra.mxu0 %v24_v28  ;;  %290 = vmatpush1.msra.mxu1 %v26_v29 }
  0x11   :  { %220 = vmatprep.subr.mxu0 %v17_v30  ;;  %291 = vmatprep.subr.mxu1 %v19_v31 }
  0x12   :  { %221 = vmatpush1.msra.mxu0 %v16_v32  ;;  %254 = vmatprep.mubr.f32.mxu0 %v373_v3 }
  0x13   :  { %292 = vmatpush1.msra.mxu1 %v18_v33  ;;  %325 = vmatprep.mubr.f32.mxu1 %v373_v3 }
  0x14   :  { %370 = vmatmul.mubr.msk.f32.vlgmr.msra.gmra.mxu0 %vm44_vm0, %v11_v17  ;;  %371 = vmatmul.mubr.msk.f32.vlgmr.msra.gmra.mxu1 %vm44_vm0, %v11_v17 }
  0xca   :  { %v114_v34 = vpop.f32.mrf.mxu0  ;;  %v185_v35 = vpop.f32.mrf.mxu1 }
  0xcb   :  { %vm332_vm1 = vcmp.ge.f32.partialorder %v114_v34, 0.0  ;;  %v340_v36 = vmul.f32 0.1, %v114_v34  ;;  %vm334_vm2 = vcmp.ge.f32.partialorder %v185_v35, 0.0  ;;  %v342_v37 = vmul.f32 0.1, %v185_v35 }
  0xcc   :  { %v116_v38 = vpop.f32.mrf.mxu0  ;;  %v187_v39 = vpop.f32.mrf.mxu1 }
  0xcd   :  { %v348_v40 = vsel %vm332_vm1, %v114_v34, %v340_v36  ;;  %v350_v41 = vsel %vm334_vm2, %v185_v35, %v342_v37  ;;  %vm333_vm3 = vcmp.ge.f32.partialorder %v116_v38, 0.0  ;;  %v341_v42 = vmul.f32 0.1, %v116_v38 }
  0xce   :  { %356 = vst [vmem:[%s522_s2] sm:$0xff] %v348_v40  ;;  %358 = vst [vmem:[%s522_s2 + $0x10] sm:$0xff] %v350_v41  ;;  %vm335_vm4 = vcmp.ge.f32.partialorder %v187_v39, 0.0  ;;  %v343_v43 = vmul.f32 0.1, %v187_v39 }
  0xcf   :  { %v349_v44 = vsel %vm333_vm3, %v116_v38, %v341_v42 }
  0xd0   :  { %357 = vst [vmem:[%s522_s2 + $0x8] sm:$0xff] %v349_v44  ;;  %v351_v45 = vsel %vm335_vm4, %v187_v39, %v343_v43 }
  0xd1   :  { %359 = vst [vmem:[%s522_s2 + $0x18] sm:$0xff] %v351_v45 }
  0xd4   :  { %v256_v46 = vpop.f32.mrf.mxu0  ;;  %v327_v47 = vpop.f32.mrf.mxu1 }
  0xd5   :  { %vm336_vm5 = vcmp.ge.f32.partialorder %v256_v46, 0.0  ;;  %v344_v48 = vmul.f32 0.1, %v256_v46  ;;  %vm338_vm6 = vcmp.ge.f32.partialorder %v327_v47, 0.0  ;;  %v346_v49 = vmul.f32 0.1, %v327_v47 }
  0xd6   :  { %v258_v50 = vpop.f32.mrf.mxu0  ;;  %v329_v51 = vpop.f32.mrf.mxu1 }
  0xd7   :  { %v352_v52 = vsel %vm336_vm5, %v256_v46, %v344_v48  ;;  %v354_v53 = vsel %vm338_vm6, %v327_v47, %v346_v49  ;;  %vm337_vm7 = vcmp.ge.f32.partialorder %v258_v50, 0.0  ;;  %v345_v54 = vmul.f32 0.1, %v258_v50 }
  0xd8   :  { %360 = vst [vmem:[%s522_s2 + $0x20] sm:$0xff] %v352_v52  ;;  %362 = vst [vmem:[%s522_s2 + $0x30] sm:$0xff] %v354_v53  ;;  %vm339_vm8 = vcmp.ge.f32.partialorder %v329_v51, 0.0  ;;  %v347_v55 = vmul.f32 0.1, %v329_v51 }
  0xd9   :  { %v353_v56 = vsel %vm337_vm7, %v258_v50, %v345_v54 }
  0xda   :  { %361 = vst [vmem:[%s522_s2 + $0x28] sm:$0xff] %v353_v56  ;;  %v355_v57 = vsel %vm339_vm8, %v329_v51, %v347_v55 }
  0xdb   :  { %363 = vst [vmem:[%s522_s2 + $0x38] sm:$0xff] %v355_v57 }

// kernel: selective_matching_crossview_forward.5
= control target key start
LH: loop header
LB: loop body
LE: loop exit
PB: predicated region body
PF: predicated region fallthrough
CT: control target
= control target key end

     0   :  { %vm157_vm0 = vcmask 130048   ;;  %s978_s1 = inlined_call_operand.vmem [shape: f32[144,1024], index: 1, kind: input, shape index: {}]   ;;  %s979_s0 = inlined_call_operand.vmem [shape: f32[8,144], index: 0, kind: input, shape index: {}]   ;;  %s980_s2 = inlined_call_operand.vmem [shape: f32[8,1024], index: 2, kind: output, shape index: {}]  }
   0x1   :  { %v134_v0 = vld [vmem:[%s978_s1 + $0x3c8] sm:$0xff]  ;;  %v136_v1 = vld [vmem:[%s978_s1 + $0x3d8] sm:$0xff]  ;;  %v133_v2 = vld [vmem:[%s978_s1 + $0x3c0] sm:$0xff] }
   0x2   :  { %161 = vmatprep.subr.mxu0 %v134_v0  ;;  %232 = vmatprep.subr.mxu1 %v136_v1  ;;  %v135_v3 = vld [vmem:[%s978_s1 + $0x3d0] sm:$0xff]  ;;  %v126_v4 = vld [vmem:[%s978_s1 + $0x388] sm:$0xff]  ;;  %v128_v5 = vld [vmem:[%s978_s1 + $0x398] sm:$0xff] }
   0x3   :  { %162 = vmatpush1.msra.mxu0 %v133_v2  ;;  %233 = vmatpush1.msra.mxu1 %v135_v3  ;;  %v125_v6 = vld [vmem:[%s978_s1 + $0x380] sm:$0xff]  ;;  %v127_v7 = vld [vmem:[%s978_s1 + $0x390] sm:$0xff]  ;;  %v118_v8 = vld [vmem:[%s978_s1 + $0x348] sm:$0xff] }
   0x4   :  { %163 = vmatprep.subr.mxu0 %v126_v4  ;;  %234 = vmatprep.subr.mxu1 %v128_v5  ;;  %v120_v9 = vld [vmem:[%s978_s1 + $0x358] sm:$0xff]  ;;  %v117_v10 = vld [vmem:[%s978_s1 + $0x340] sm:$0xff]  ;;  %v119_v11 = vld [vmem:[%s978_s1 + $0x350] sm:$0xff] }
   0x5   :  { %164 = vmatpush1.msra.mxu0 %v125_v6  ;;  %235 = vmatpush1.msra.mxu1 %v127_v7  ;;  %v110_v12 = vld [vmem:[%s978_s1 + $0x308] sm:$0xff]  ;;  %v112_v13 = vld [vmem:[%s978_s1 + $0x318] sm:$0xff]  ;;  %v109_v14 = vld [vmem:[%s978_s1 + $0x300] sm:$0xff] }
   0x6   :  { %165 = vmatprep.subr.mxu0 %v118_v8  ;;  %236 = vmatprep.subr.mxu1 %v120_v9  ;;  %v111_v15 = vld [vmem:[%s978_s1 + $0x310] sm:$0xff]  ;;  %v102_v16 = vld [vmem:[%s978_s1 + $0x2c8] sm:$0xff]  ;;  %v104_v17 = vld [vmem:[%s978_s1 + $0x2d8] sm:$0xff] }
   0x7   :  { %166 = vmatpush1.msra.mxu0 %v117_v10  ;;  %237 = vmatpush1.msra.mxu1 %v119_v11  ;;  %v101_v18 = vld [vmem:[%s978_s1 + $0x2c0] sm:$0xff]  ;;  %v103_v19 = vld [vmem:[%s978_s1 + $0x2d0] sm:$0xff]  ;;  %v94_v20 = vld [vmem:[%s978_s1 + $0x288] sm:$0xff] }
   0x8   :  { %167 = vmatprep.subr.mxu0 %v110_v12  ;;  %238 = vmatprep.subr.mxu1 %v112_v13  ;;  %v96_v21 = vld [vmem:[%s978_s1 + $0x298] sm:$0xff]  ;;  %v93_v22 = vld [vmem:[%s978_s1 + $0x280] sm:$0xff]  ;;  %v95_v23 = vld [vmem:[%s978_s1 + $0x290] sm:$0xff] }
   0x9   :  { %168 = vmatpush1.msra.mxu0 %v109_v14  ;;  %239 = vmatpush1.msra.mxu1 %v111_v15  ;;  %v86_v24 = vld [vmem:[%s978_s1 + $0x248] sm:$0xff]  ;;  %v88_v25 = vld [vmem:[%s978_s1 + $0x258] sm:$0xff]  ;;  %v85_v26 = vld [vmem:[%s978_s1 + $0x240] sm:$0xff] }
   0xa   :  { %169 = vmatprep.subr.mxu0 %v102_v16  ;;  %240 = vmatprep.subr.mxu1 %v104_v17  ;;  %v87_v27 = vld [vmem:[%s978_s1 + $0x250] sm:$0xff]  ;;  %v78_v28 = vld [vmem:[%s978_s1 + $0x208] sm:$0xff]  ;;  %v80_v29 = vld [vmem:[%s978_s1 + $0x218] sm:$0xff] }
   0xb   :  { %170 = vmatpush1.msra.mxu0 %v101_v18  ;;  %241 = vmatpush1.msra.mxu1 %v103_v19  ;;  %v77_v30 = vld [vmem:[%s978_s1 + $0x200] sm:$0xff]  ;;  %v79_v31 = vld [vmem:[%s978_s1 + $0x210] sm:$0xff]  ;;  %v70_v32 = vld [vmem:[%s978_s1 + $0x1c8] sm:$0xff] }
   0xc   :  { %171 = vmatprep.subr.mxu0 %v94_v20  ;;  %242 = vmatprep.subr.mxu1 %v96_v21  ;;  %v72_v33 = vld [vmem:[%s978_s1 + $0x1d8] sm:$0xff]  ;;  %v69_v34 = vld [vmem:[%s978_s1 + $0x1c0] sm:$0xff]  ;;  %v71_v35 = vld [vmem:[%s978_s1 + $0x1d0] sm:$0xff] }
   0xd   :  { %172 = vmatpush1.msra.mxu0 %v93_v22  ;;  %243 = vmatpush1.msra.mxu1 %v95_v23  ;;  %v62_v36 = vld [vmem:[%s978_s1 + $0x188] sm:$0xff]  ;;  %v64_v37 = vld [vmem:[%s978_s1 + $0x198] sm:$0xff]  ;;  %v61_v38 = vld [vmem:[%s978_s1 + $0x180] sm:$0xff] }
   0xe   :  { %173 = vmatprep.subr.mxu0 %v86_v24  ;;  %244 = vmatprep.subr.mxu1 %v88_v25  ;;  %v63_v39 = vld [vmem:[%s978_s1 + $0x190] sm:$0xff]  ;;  %v54_v40 = vld [vmem:[%s978_s1 + $0x148] sm:$0xff]  ;;  %v56_v41 = vld [vmem:[%s978_s1 + $0x158] sm:$0xff] }
   0xf   :  { %174 = vmatpush1.msra.mxu0 %v85_v26  ;;  %245 = vmatpush1.msra.mxu1 %v87_v27  ;;  %v53_v42 = vld [vmem:[%s978_s1 + $0x140] sm:$0xff]  ;;  %v55_v43 = vld [vmem:[%s978_s1 + $0x150] sm:$0xff]  ;;  %v46_v44 = vld [vmem:[%s978_s1 + $0x108] sm:$0xff] }
  0x10   :  { %175 = vmatprep.subr.mxu0 %v78_v28  ;;  %246 = vmatprep.subr.mxu1 %v80_v29  ;;  %v48_v45 = vld [vmem:[%s978_s1 + $0x118] sm:$0xff]  ;;  %v45_v46 = vld [vmem:[%s978_s1 + $0x100] sm:$0xff]  ;;  %v47_v47 = vld [vmem:[%s978_s1 + $0x110] sm:$0xff] }
  0x11   :  { %176 = vmatpush1.msra.mxu0 %v77_v30  ;;  %247 = vmatpush1.msra.mxu1 %v79_v31  ;;  %v38_v48 = vld [vmem:[%s978_s1 + $0xc8] sm:$0xff]  ;;  %v40_v49 = vld [vmem:[%s978_s1 + $0xd8] sm:$0xff]  ;;  %v37_v50 = vld [vmem:[%s978_s1 + $0xc0] sm:$0xff] }
  0x12   :  { %177 = vmatprep.subr.mxu0 %v70_v32  ;;  %248 = vmatprep.subr.mxu1 %v72_v33  ;;  %v39_v51 = vld [vmem:[%s978_s1 + $0xd0] sm:$0xff]  ;;  %v30_v52 = vld [vmem:[%s978_s1 + $0x88] sm:$0xff]  ;;  %v32_v53 = vld [vmem:[%s978_s1 + $0x98] sm:$0xff] }
  0x13   :  { %178 = vmatpush1.msra.mxu0 %v69_v34  ;;  %249 = vmatpush1.msra.mxu1 %v71_v35  ;;  %v29_v54 = vld [vmem:[%s978_s1 + $0x80] sm:$0xff]  ;;  %v31_v55 = vld [vmem:[%s978_s1 + $0x90] sm:$0xff]  ;;  %v22_v56 = vld [vmem:[%s978_s1 + $0x48] sm:$0xff] }
  0x14   :  { %179 = vmatprep.subr.mxu0 %v62_v36  ;;  %250 = vmatprep.subr.mxu1 %v64_v37  ;;  %v24_v57 = vld [vmem:[%s978_s1 + $0x58] sm:$0xff]  ;;  %v21_v58 = vld [vmem:[%s978_s1 + $0x40] sm:$0xff]  ;;  %v23_v59 = vld [vmem:[%s978_s1 + $0x50] sm:$0xff] }
  0x15   :  { %180 = vmatpush1.msra.mxu0 %v61_v38  ;;  %251 = vmatpush1.msra.mxu1 %v63_v39  ;;  %v14_v60 = vld [vmem:[%s978_s1 + $0x8] sm:$0xff]  ;;  %v16_v61 = vld [vmem:[%s978_s1 + $0x18] sm:$0xff]  ;;  %v13_v62 = vld [vmem:[%s978_s1] sm:$0xff] }
  0x16   :  { %181 = vmatprep.subr.mxu0 %v54_v40  ;;  %252 = vmatprep.subr.mxu1 %v56_v41  ;;  %v15_v63 = vld [vmem:[%s978_s1 + $0x10] sm:$0xff]  ;;  %v150_v0 = vld [vmem:[%s978_s1 + $0x448] sm:$0xff]  ;;  %v152_v1 = vld [vmem:[%s978_s1 + $0x458] sm:$0xff] }
  0x17   :  { %182 = vmatpush1.msra.mxu0 %v53_v42  ;;  %253 = vmatpush1.msra.mxu1 %v55_v43  ;;  %v149_v2 = vld [vmem:[%s978_s1 + $0x440] sm:$0xff]  ;;  %v151_v3 = vld [vmem:[%s978_s1 + $0x450] sm:$0xff]  ;;  %v142_v4 = vld [vmem:[%s978_s1 + $0x408] sm:$0xff] }
  0x18   :  { %183 = vmatprep.subr.mxu0 %v46_v44  ;;  %254 = vmatprep.subr.mxu1 %v48_v45  ;;  %v144_v5 = vld [vmem:[%s978_s1 + $0x418] sm:$0xff]  ;;  %v141_v6 = vld [vmem:[%s978_s1 + $0x400] sm:$0xff]  ;;  %v716_v7 = vld [vmem:[%s979_s0 + $0x8] sm:$0xff] }
  0x19   :  { %184 = vmatpush1.msra.mxu0 %v45_v46  ;;  %255 = vmatpush1.msra.mxu1 %v47_v47  ;;  %v143_v8 = vld [vmem:[%s978_s1 + $0x410] sm:$0xff]  ;;  %v724_v9 = vld [vmem:[%s979_s0] sm:$0xff]  ;;  %v138_v10 = vld [vmem:[%s978_s1 + $0x3e8] sm:$0xff] }
  0x1a   :  { %185 = vmatprep.subr.mxu0 %v38_v48  ;;  %256 = vmatprep.subr.mxu1 %v40_v49  ;;  %v140_v11 = vld [vmem:[%s978_s1 + $0x3f8] sm:$0xff]  ;;  %v137_v12 = vld [vmem:[%s978_s1 + $0x3e0] sm:$0xff]  ;;  %v139_v13 = vld [vmem:[%s978_s1 + $0x3f0] sm:$0xff] }
  0x1b   :  { %186 = vmatpush1.msra.mxu0 %v37_v50  ;;  %257 = vmatpush1.msra.mxu1 %v39_v51  ;;  %v130_v14 = vld [vmem:[%s978_s1 + $0x3a8] sm:$0xff]  ;;  %v132_v15 = vld [vmem:[%s978_s1 + $0x3b8] sm:$0xff]  ;;  %v129_v16 = vld [vmem:[%s978_s1 + $0x3a0] sm:$0xff] }
  0x1c   :  { %187 = vmatprep.subr.mxu0 %v30_v52  ;;  %258 = vmatprep.subr.mxu1 %v32_v53  ;;  %v131_v17 = vld [vmem:[%s978_s1 + $0x3b0] sm:$0xff]  ;;  %v122_v18 = vld [vmem:[%s978_s1 + $0x368] sm:$0xff]  ;;  %v124_v19 = vld [vmem:[%s978_s1 + $0x378] sm:$0xff] }
  0x1d   :  { %188 = vmatpush1.msra.mxu0 %v29_v54  ;;  %259 = vmatpush1.msra.mxu1 %v31_v55  ;;  %v121_v20 = vld [vmem:[%s978_s1 + $0x360] sm:$0xff]  ;;  %v123_v21 = vld [vmem:[%s978_s1 + $0x370] sm:$0xff]  ;;  %v114_v22 = vld [vmem:[%s978_s1 + $0x328] sm:$0xff] }
  0x1e   :  { %189 = vmatprep.subr.mxu0 %v22_v56  ;;  %260 = vmatprep.subr.mxu1 %v24_v57  ;;  %v116_v23 = vld [vmem:[%s978_s1 + $0x338] sm:$0xff]  ;;  %v113_v24 = vld [vmem:[%s978_s1 + $0x320] sm:$0xff]  ;;  %v115_v25 = vld [vmem:[%s978_s1 + $0x330] sm:$0xff] }
  0x1f   :  { %190 = vmatpush1.msra.mxu0 %v21_v58  ;;  %261 = vmatpush1.msra.mxu1 %v23_v59  ;;  %v106_v26 = vld [vmem:[%s978_s1 + $0x2e8] sm:$0xff]  ;;  %v108_v27 = vld [vmem:[%s978_s1 + $0x2f8] sm:$0xff]  ;;  %v105_v28 = vld [vmem:[%s978_s1 + $0x2e0] sm:$0xff] }
  0x20   :  { %191 = vmatprep.subr.mxu0 %v14_v60  ;;  %262 = vmatprep.subr.mxu1 %v16_v61  ;;  %v107_v29 = vld [vmem:[%s978_s1 + $0x2f0] sm:$0xff]  ;;  %v98_v30 = vld [vmem:[%s978_s1 + $0x2a8] sm:$0xff]  ;;  %v100_v31 = vld [vmem:[%s978_s1 + $0x2b8] sm:$0xff] }
  0x21   :  { %192 = vmatpush1.msra.mxu0 %v13_v62  ;;  %263 = vmatpush1.msra.mxu1 %v15_v63  ;;  %v97_v32 = vld [vmem:[%s978_s1 + $0x2a0] sm:$0xff]  ;;  %v99_v33 = vld [vmem:[%s978_s1 + $0x2b0] sm:$0xff]  ;;  %v90_v34 = vld [vmem:[%s978_s1 + $0x268] sm:$0xff] }
  0x22   :  { %221 = vmatprep.subr.mxu0 %v150_v0  ;;  %292 = vmatprep.subr.mxu1 %v152_v1  ;;  %v92_v35 = vld [vmem:[%s978_s1 + $0x278] sm:$0xff]  ;;  %v89_v36 = vld [vmem:[%s978_s1 + $0x260] sm:$0xff]  ;;  %v91_v37 = vld [vmem:[%s978_s1 + $0x270] sm:$0xff] }
  0x23   :  { %222 = vmatpush2.msra.mxu0 %v149_v2  ;;  %293 = vmatpush2.msra.mxu1 %v151_v3  ;;  %v82_v38 = vld [vmem:[%s978_s1 + $0x228] sm:$0xff]  ;;  %v84_v39 = vld [vmem:[%s978_s1 + $0x238] sm:$0xff]  ;;  %v81_v40 = vld [vmem:[%s978_s1 + $0x220] sm:$0xff] }
  0x24   :  { %223 = vmatprep.subr.mxu0 %v142_v4  ;;  %294 = vmatprep.subr.mxu1 %v144_v5  ;;  %v83_v41 = vld [vmem:[%s978_s1 + $0x230] sm:$0xff]  ;;  %v74_v42 = vld [vmem:[%s978_s1 + $0x1e8] sm:$0xff]  ;;  %v76_v43 = vld [vmem:[%s978_s1 + $0x1f8] sm:$0xff] }
  0x25   :  { %224 = vmatpush2.msra.mxu0 %v141_v6  ;;  %481 = vmatprep.mubr.msk.f32.mxu0 %vm157_vm0, %v716_v7  ;;  %v73_v44 = vld [vmem:[%s978_s1 + $0x1e0] sm:$0xff]  ;;  %v75_v45 = vld [vmem:[%s978_s1 + $0x1f0] sm:$0xff]  ;;  %v66_v46 = vld [vmem:[%s978_s1 + $0x1a8] sm:$0xff] }
  0x26   :  { %295 = vmatpush2.msra.mxu1 %v143_v8  ;;  %482 = vmatprep.mubr.msk.f32.mxu1 %vm157_vm0, %v716_v7  ;;  %v68_v47 = vld [vmem:[%s978_s1 + $0x1b8] sm:$0xff]  ;;  %v65_v48 = vld [vmem:[%s978_s1 + $0x1a0] sm:$0xff]  ;;  %v67_v49 = vld [vmem:[%s978_s1 + $0x1b0] sm:$0xff] }
  0x27   :  { %226 = vmatmul.mubr.f32.vlgmr.msra.gmra.mxu0 %v724_v9  ;;  %297 = vmatmul.mubr.f32.vlgmr.msra.gmra.mxu1 %v724_v9  ;;  %v58_v50 = vld [vmem:[%s978_s1 + $0x168] sm:$0xff]  ;;  %v60_v51 = vld [vmem:[%s978_s1 + $0x178] sm:$0xff]  ;;  %v57_v52 = vld [vmem:[%s978_s1 + $0x160] sm:$0xff] }
  0x28   :  { %303 = vmatprep.subr.mxu0 %v138_v10  ;;  %374 = vmatprep.subr.mxu1 %v140_v11  ;;  %v59_v53 = vld [vmem:[%s978_s1 + $0x170] sm:$0xff]  ;;  %v50_v54 = vld [vmem:[%s978_s1 + $0x128] sm:$0xff]  ;;  %v52_v55 = vld [vmem:[%s978_s1 + $0x138] sm:$0xff] }
  0x29   :  { %304 = vmatpush1.msra.mxu0 %v137_v12  ;;  %375 = vmatpush1.msra.mxu1 %v139_v13  ;;  %v49_v56 = vld [vmem:[%s978_s1 + $0x120] sm:$0xff]  ;;  %v51_v57 = vld [vmem:[%s978_s1 + $0x130] sm:$0xff]  ;;  %v42_v58 = vld [vmem:[%s978_s1 + $0xe8] sm:$0xff] }
  0x2a   :  { %305 = vmatprep.subr.mxu0 %v130_v14  ;;  %376 = vmatprep.subr.mxu1 %v132_v15  ;;  %v44_v59 = vld [vmem:[%s978_s1 + $0xf8] sm:$0xff]  ;;  %v41_v60 = vld [vmem:[%s978_s1 + $0xe0] sm:$0xff]  ;;  %v43_v61 = vld [vmem:[%s978_s1 + $0xf0] sm:$0xff] }
  0x2b   :  { %306 = vmatpush1.msra.mxu0 %v129_v16  ;;  %377 = vmatpush1.msra.mxu1 %v131_v17  ;;  %v34_v62 = vld [vmem:[%s978_s1 + $0xa8] sm:$0xff]  ;;  %v36_v63 = vld [vmem:[%s978_s1 + $0xb8] sm:$0xff]  ;;  %v33_v0 = vld [vmem:[%s978_s1 + $0xa0] sm:$0xff] }
  0x2c   :  { %307 = vmatprep.subr.mxu0 %v122_v18  ;;  %378 = vmatprep.subr.mxu1 %v124_v19  ;;  %v35_v1 = vld [vmem:[%s978_s1 + $0xb0] sm:$0xff]  ;;  %v26_v2 = vld [vmem:[%s978_s1 + $0x68] sm:$0xff]  ;;  %v28_v3 = vld [vmem:[%s978_s1 + $0x78] sm:$0xff] }
  0x2d   :  { %308 = vmatpush1.msra.mxu0 %v121_v20  ;;  %379 = vmatpush1.msra.mxu1 %v123_v21  ;;  %v25_v4 = vld [vmem:[%s978_s1 + $0x60] sm:$0xff]  ;;  %v27_v5 = vld [vmem:[%s978_s1 + $0x70] sm:$0xff]  ;;  %v18_v6 = vld [vmem:[%s978_s1 + $0x28] sm:$0xff] }
  0x2e   :  { %309 = vmatprep.subr.mxu0 %v114_v22  ;;  %380 = vmatprep.subr.mxu1 %v116_v23  ;;  %v20_v8 = vld [vmem:[%s978_s1 + $0x38] sm:$0xff]  ;;  %v17_v10 = vld [vmem:[%s978_s1 + $0x20] sm:$0xff]  ;;  %v19_v11 = vld [vmem:[%s978_s1 + $0x30] sm:$0xff] }
  0x2f   :  { %310 = vmatpush1.msra.mxu0 %v113_v24  ;;  %381 = vmatpush1.msra.mxu1 %v115_v25  ;;  %v154_v12 = vld [vmem:[%s978_s1 + $0x468] sm:$0xff]  ;;  %v156_v13 = vld [vmem:[%s978_s1 + $0x478] sm:$0xff]  ;;  %v153_v14 = vld [vmem:[%s978_s1 + $0x460] sm:$0xff] }
  0x30   :  { %311 = vmatprep.subr.mxu0 %v106_v26  ;;  %382 = vmatprep.subr.mxu1 %v108_v27  ;;  %v155_v15 = vld [vmem:[%s978_s1 + $0x470] sm:$0xff]  ;;  %v146_v16 = vld [vmem:[%s978_s1 + $0x428] sm:$0xff]  ;;  %v148_v17 = vld [vmem:[%s978_s1 + $0x438] sm:$0xff] }
  0x31   :  { %312 = vmatpush1.msra.mxu0 %v105_v28  ;;  %383 = vmatpush1.msra.mxu1 %v107_v29  ;;  %v145_v18 = vld [vmem:[%s978_s1 + $0x420] sm:$0xff]  ;;  %v147_v19 = vld [vmem:[%s978_s1 + $0x430] sm:$0xff] }
  0x32   :  { %313 = vmatprep.subr.mxu0 %v98_v30  ;;  %384 = vmatprep.subr.mxu1 %v100_v31 }
  0x33   :  { %314 = vmatpush1.msra.mxu0 %v97_v32  ;;  %385 = vmatpush1.msra.mxu1 %v99_v33 }
  0x34   :  { %315 = vmatprep.subr.mxu0 %v90_v34  ;;  %386 = vmatprep.subr.mxu1 %v92_v35 }
  0x35   :  { %316 = vmatpush1.msra.mxu0 %v89_v36  ;;  %387 = vmatpush1.msra.mxu1 %v91_v37 }
  0x36   :  { %317 = vmatprep.subr.mxu0 %v82_v38  ;;  %388 = vmatprep.subr.mxu1 %v84_v39 }
  0x37   :  { %318 = vmatpush1.msra.mxu0 %v81_v40  ;;  %389 = vmatpush1.msra.mxu1 %v83_v41 }
  0x38   :  { %319 = vmatprep.subr.mxu0 %v74_v42  ;;  %390 = vmatprep.subr.mxu1 %v76_v43 }
  0x39   :  { %320 = vmatpush1.msra.mxu0 %v73_v44  ;;  %391 = vmatpush1.msra.mxu1 %v75_v45 }
  0x3a   :  { %321 = vmatprep.subr.mxu0 %v66_v46  ;;  %392 = vmatprep.subr.mxu1 %v68_v47 }
  0x3b   :  { %322 = vmatpush1.msra.mxu0 %v65_v48  ;;  %393 = vmatpush1.msra.mxu1 %v67_v49 }
  0x3c   :  { %323 = vmatprep.subr.mxu0 %v58_v50  ;;  %394 = vmatprep.subr.mxu1 %v60_v51 }
  0x3d   :  { %324 = vmatpush1.msra.mxu0 %v57_v52  ;;  %395 = vmatpush1.msra.mxu1 %v59_v53 }
  0x3e   :  { %325 = vmatprep.subr.mxu0 %v50_v54  ;;  %396 = vmatprep.subr.mxu1 %v52_v55 }
  0x3f   :  { %326 = vmatpush1.msra.mxu0 %v49_v56  ;;  %397 = vmatpush1.msra.mxu1 %v51_v57 }
  0x40   :  { %327 = vmatprep.subr.mxu0 %v42_v58  ;;  %398 = vmatprep.subr.mxu1 %v44_v59 }
  0x41   :  { %328 = vmatpush1.msra.mxu0 %v41_v60  ;;  %399 = vmatpush1.msra.mxu1 %v43_v61 }
  0x42   :  { %329 = vmatprep.subr.mxu0 %v34_v62  ;;  %400 = vmatprep.subr.mxu1 %v36_v63 }
  0x43   :  { %330 = vmatpush1.msra.mxu0 %v33_v0  ;;  %401 = vmatpush1.msra.mxu1 %v35_v1 }
  0x44   :  { %331 = vmatprep.subr.mxu0 %v26_v2  ;;  %402 = vmatprep.subr.mxu1 %v28_v3 }
  0x45   :  { %332 = vmatpush1.msra.mxu0 %v25_v4  ;;  %403 = vmatpush1.msra.mxu1 %v27_v5 }
  0x46   :  { %333 = vmatprep.subr.mxu0 %v18_v6  ;;  %404 = vmatprep.subr.mxu1 %v20_v8 }
  0x47   :  { %334 = vmatpush1.msra.mxu0 %v17_v10  ;;  %405 = vmatpush1.msra.mxu1 %v19_v11 }
  0x48   :  { %363 = vmatprep.subr.mxu0 %v154_v12  ;;  %434 = vmatprep.subr.mxu1 %v156_v13 }
  0x49   :  { %364 = vmatpush2.msra.mxu0 %v153_v14  ;;  %435 = vmatpush2.msra.mxu1 %v155_v15 }
  0x4a   :  { %365 = vmatprep.subr.mxu0 %v146_v16  ;;  %436 = vmatprep.subr.mxu1 %v148_v17 }
  0x4b   :  { %366 = vmatpush2.msra.mxu0 %v145_v18  ;;  %483 = vmatprep.mubr.msk.f32.mxu0 %vm157_vm0, %v716_v7 }
  0x4c   :  { %437 = vmatpush2.msra.mxu1 %v147_v19  ;;  %484 = vmatprep.mubr.msk.f32.mxu1 %vm157_vm0, %v716_v7 }
  0x4d   :  { %368 = vmatmul.mubr.f32.vlgmr.msra.gmra.mxu0 %v724_v9  ;;  %439 = vmatmul.mubr.f32.vlgmr.msra.gmra.mxu1 %v724_v9 }
  0xe7   :  { %v227_v20 = vpop.f32.mrf.mxu0  ;;  %v298_v21 = vpop.f32.mrf.mxu1 }
  0xe8   :  { %vm445_vm1 = vcmp.ge.f32.partialorder %v227_v20, 0.0  ;;  %v453_v22 = vmul.f32 0.1, %v227_v20  ;;  %vm447_vm2 = vcmp.ge.f32.partialorder %v298_v21, 0.0  ;;  %v455_v23 = vmul.f32 0.1, %v298_v21 }
  0xe9   :  { %v229_v24 = vpop.f32.mrf.mxu0  ;;  %v300_v25 = vpop.f32.mrf.mxu1 }
  0xea   :  { %v461_v26 = vsel %vm445_vm1, %v227_v20, %v453_v22  ;;  %v463_v27 = vsel %vm447_vm2, %v298_v21, %v455_v23  ;;  %vm446_vm3 = vcmp.ge.f32.partialorder %v229_v24, 0.0  ;;  %v454_v28 = vmul.f32 0.1, %v229_v24 }
  0xeb   :  { %469 = vst [vmem:[%s980_s2] sm:$0xff] %v461_v26  ;;  %471 = vst [vmem:[%s980_s2 + $0x10] sm:$0xff] %v463_v27  ;;  %vm448_vm4 = vcmp.ge.f32.partialorder %v300_v25, 0.0  ;;  %v456_v7 = vmul.f32 0.1, %v300_v25 }
  0xec   :  { %v462_v9 = vsel %vm446_vm3, %v229_v24, %v454_v28 }
  0xed   :  { %470 = vst [vmem:[%s980_s2 + $0x8] sm:$0xff] %v462_v9  ;;  %v464_v29 = vsel %vm448_vm4, %v300_v25, %v456_v7 }
  0xee   :  { %472 = vst [vmem:[%s980_s2 + $0x18] sm:$0xff] %v464_v29 }
 0x10d   :  { %v369_v30 = vpop.f32.mrf.mxu0  ;;  %v440_v31 = vpop.f32.mrf.mxu1 }
 0x10e   :  { %vm449_vm5 = vcmp.ge.f32.partialorder %v369_v30, 0.0  ;;  %v457_v32 = vmul.f32 0.1, %v369_v30  ;;  %vm451_vm6 = vcmp.ge.f32.partialorder %v440_v31, 0.0  ;;  %v459_v33 = vmul.f32 0.1, %v440_v31 }
 0x10f   :  { %v371_v34 = vpop.f32.mrf.mxu0  ;;  %v442_v35 = vpop.f32.mrf.mxu1 }
 0x110   :  { %v465_v36 = vsel %vm449_vm5, %v369_v30, %v457_v32  ;;  %v467_v37 = vsel %vm451_vm6, %v440_v31, %v459_v33  ;;  %vm450_vm7 = vcmp.ge.f32.partialorder %v371_v34, 0.0  ;;  %v458_v38 = vmul.f32 0.1, %v371_v34 }
 0x111   :  { %473 = vst [vmem:[%s980_s2 + $0x20] sm:$0xff] %v465_v36  ;;  %475 = vst [vmem:[%s980_s2 + $0x30] sm:$0xff] %v467_v37  ;;  %vm452_vm8 = vcmp.ge.f32.partialorder %v442_v35, 0.0  ;;  %v460_v39 = vmul.f32 0.1, %v442_v35 }
 0x112   :  { %v466_v40 = vsel %vm450_vm7, %v371_v34, %v458_v38 }
 0x113   :  { %474 = vst [vmem:[%s980_s2 + $0x28] sm:$0xff] %v466_v40  ;;  %v468_v41 = vsel %vm452_vm8, %v442_v35, %v460_v39 }
 0x114   :  { %476 = vst [vmem:[%s980_s2 + $0x38] sm:$0xff] %v468_v41 }

</bundles_post_ra>
